<compile_context>
chip_gen: v7x
topology: tpu7x:2x2x1
jax: 0.10.0
libtpu: 0.0.40
codegen_flags: <defaults>
</compile_context>

<pallas_src>
import functools

import numpy as np

import jax
import jax.numpy as jnp
from jax import lax
from jax.experimental import pallas as pl
from jax.experimental.pallas import tpu as pltpu

LANE = 128


def _round_up(x, m):
    return (x + m - 1) // m * m


# -----------------------------------------------------------------------------
# Fused Pallas kernel: conv1 -> conv2 -> DM linear1 -> DM linear2
# -----------------------------------------------------------------------------
def _typhon_fused_kernel(x_ref, w1_ref, b1_ref, w2_ref, b2_ref,
                         wd1_ref, bd1_ref, wd2_ref, bd2_ref,
                         out_ref, xp2_ref, a2_ref):
    f32 = jnp.float32
    bf16 = jnp.bfloat16

    NB, Hp2, WCin = x_ref.shape          # input block: [NB, H+2, W*Cin] (bf16)
    H = Hp2 - 2
    WC1 = w1_ref.shape[2]
    WC2 = w2_ref.shape[2]
    HIDP = wd1_ref.shape[2]

    # ---------------- Conv1 (3x3, pad=1) ----------------
    # Input is already lane-dense (lane = w*Cin + c) and H-halo padded, so each
    # kh tap is a plain sublane slice; kw + channel mixing live in the packed
    # per-kh block-Toeplitz weight.  Accumulate the 3 taps in f32.
    acc1 = jnp.zeros((NB * H, WC1), f32)
    for kh in range(3):
        tap = x_ref[:, kh:kh + H, :].reshape(NB * H, WCin)        # bf16
        acc1 += jnp.dot(tap, w1_ref[kh], preferred_element_type=f32)
    a1 = jnp.maximum(acc1 + b1_ref[...], 0.0)                     # bias+ReLU f32
    # FE Dropout = identity (eval mode).

    # ---------------- Conv2 (3x3, pad=1) ----------------
    # bf16 padded scratch: data occupies all WC1 lanes at lane offset 0 (no kw
    # padding -- handled by the Toeplitz weights); only the two halo rows are
    # zeroed, the interior is written once.
    xp2_ref[:, 0:1, :] = jnp.zeros((NB, 1, WC1), bf16)
    xp2_ref[:, H + 1:H + 2, :] = jnp.zeros((NB, 1, WC1), bf16)
    xp2_ref[:, 1:H + 1, :] = a1.reshape(NB, H, WC1).astype(bf16)

    acc2 = jnp.zeros((NB * H, WC2), f32)
    for kh in range(3):
        tap = xp2_ref[:, kh:kh + H, :].reshape(NB * H, WC1)       # bf16
        acc2 += jnp.dot(tap, w2_ref[kh], preferred_element_type=f32)
    a2 = jnp.maximum(acc2 + b2_ref[...], 0.0)
    # FE Dropout = identity (eval mode).

    # ---------------- Decision maker ----------------
    # Flatten-free DM linear-1: wd1 is packed [H, W*C2, hidden]; accumulate an
    # H-unrolled loop of [NB, W*C2] @ [W*C2, hidden] matmuls in f32.
    a2_ref[...] = a2.reshape(NB, H, WC2).astype(bf16)
    hid = jnp.zeros((NB, HIDP), f32)
    for h in range(H):
        hid += jnp.dot(a2_ref[:, h, :], wd1_ref[h], preferred_element_type=f32)
    hid = jnp.maximum(hid + bd1_ref[...], 0.0)                    # ReLU (Dropout=id)

    logits = jnp.dot(hid.astype(bf16), wd2_ref[...], preferred_element_type=f32)
    out_ref[...] = (logits + bd2_ref[...]).astype(out_ref.dtype)  # lane-dense (128)


def _pick_batch_block(n):
    """Batch block: multiple of 8 when possible (fills MXU rows), else full N."""
    for nb in (32, 16, 8):
        if n % nb == 0:
            return nb
    return n


@jax.jit
def _fused_forward(x, conv_pack, dm_pack):
    N, Cin, H, W = x.shape
    # Host-side layout plumbing (not compute): NCHW -> lane-dense [N, H, W*Cin],
    # pad the H halo, cast to bf16 for the MXU.
    x_ld = jnp.transpose(x, (0, 2, 3, 1)).reshape(N, H, W * Cin)
    x_ld = jnp.pad(x_ld, ((0, 0), (1, 1), (0, 0))).astype(jnp.bfloat16)

    WCin = W * Cin
    WC1 = conv_pack["w1"].shape[2]
    WC2 = conv_pack["w2"].shape[2]
    HIDP = dm_pack["w1"].shape[2]
    OUTP = dm_pack["w2"].shape[1]
    NB = _pick_batch_block(N)

    return pl.pallas_call(
        _typhon_fused_kernel,
        out_shape=jax.ShapeDtypeStruct((N, OUTP), jnp.float32),
        grid=(N // NB,),
        in_specs=[
            pl.BlockSpec((NB, H + 2, WCin), lambda i: (i, 0, 0)),   # input block
            pl.BlockSpec((3, WCin, WC1),    lambda i: (0, 0, 0)),   # conv1 w
            pl.BlockSpec((1, WC1),          lambda i: (0, 0)),      # conv1 b
            pl.BlockSpec((3, WC1, WC2),     lambda i: (0, 0, 0)),   # conv2 w
            pl.BlockSpec((1, WC2),          lambda i: (0, 0)),      # conv2 b
            pl.BlockSpec((H, WC2, HIDP),    lambda i: (0, 0, 0)),   # DM w1
            pl.BlockSpec((1, HIDP),         lambda i: (0, 0)),      # DM b1
            pl.BlockSpec((HIDP, OUTP),      lambda i: (0, 0)),      # DM w2
            pl.BlockSpec((1, OUTP),         lambda i: (0, 0)),      # DM b2
        ],
        out_specs=pl.BlockSpec((NB, OUTP), lambda i: (i, 0)),
        scratch_shapes=[
            pltpu.VMEM((NB, H + 2, WC1), jnp.bfloat16),   # conv2 padded act
            pltpu.VMEM((NB, H, WC2), jnp.bfloat16),       # conv2 output (bf16)
        ],
        compiler_params=pltpu.CompilerParams(
            dimension_semantics=("parallel",)),
    )(x_ld, conv_pack["w1"], conv_pack["b1"], conv_pack["w2"], conv_pack["b2"],
      dm_pack["w1"], dm_pack["b1"], dm_pack["w2"], dm_pack["b2"])


# -----------------------------------------------------------------------------
# Parameter init in native PyTorch layouts, then packing into kernel layouts.
# -----------------------------------------------------------------------------
def _xavier_uniform(key, shape, fan_in, fan_out):
    bound = (6.0 / (fan_in + fan_out)) ** 0.5
    return jax.random.uniform(key, shape, jnp.float32, -bound, bound)


def _bias_uniform(key, shape, fan_in):
    bound = 1.0 / (fan_in ** 0.5)            # PyTorch default bias init
    return jax.random.uniform(key, shape, jnp.float32, -bound, bound)


def init_typhon_params(key, cin, h, w, dset_names,
                       c1=8, c2=16, hidden=32, num_classes=10):
    """Conv2d: [out, in, kh, kw]; Linear: [out, in] (PyTorch layouts)."""
    keys = jax.random.split(key, 4 + 4 * len(dset_names))
    ks = iter(keys)
    flat = c2 * h * w
    params = {
        "fe": {
            "conv1_w": _xavier_uniform(next(ks), (c1, cin, 3, 3),
                                       fan_in=cin * 9, fan_out=c1 * 9),
            "conv1_b": _bias_uniform(next(ks), (c1,), cin * 9),
            "conv2_w": _xavier_uniform(next(ks), (c2, c1, 3, 3),
                                       fan_in=c1 * 9, fan_out=c2 * 9),
            "conv2_b": _bias_uniform(next(ks), (c2,), c1 * 9),
        },
        "dms": {},
    }
    for name in dset_names:
        params["dms"][name] = {
            "w1": _xavier_uniform(next(ks), (hidden, flat), flat, hidden),
            "b1": _bias_uniform(next(ks), (hidden,), flat),
            "w2": _xavier_uniform(next(ks), (num_classes, hidden),
                                  hidden, num_classes),
            "b2": _bias_uniform(next(ks), (num_classes,), hidden),
        }
    return params


def _pack_conv(k, W):
    """[Cout, Cin, 3, 3] -> per-kh block-Toeplitz [3, W*Cin, W*Cout].

    Lane layout is w*C + c on both sides; kw boundary handling (pad=1) is done
    by omitting out-of-range taps, so no lane padding is needed in the kernel.
    """
    cout, cin, _, _ = k.shape
    mat = np.zeros((3, W * cin, W * cout), np.float32)
    for kh in range(3):
        for kw in range(3):
            blk = k[:, :, kh, kw].T                       # [Cin, Cout]
            for wo in range(W):
                wi = wo + kw - 1
                if 0 <= wi < W:
                    mat[kh, wi * cin:(wi + 1) * cin,
                        wo * cout:(wo + 1) * cout] = blk
    return mat


def _pack_dm_raw(dm, c2, h, w):
    """Fold PyTorch's channel-major flatten (c, h, w) into per-h weight slabs:
    wd1 -> [H, W*C2, hidden] consuming the kernel's lane-dense (w*C2 + c) rows."""
    hidden = dm["w1"].shape[0]
    w1 = np.asarray(dm["w1"]).reshape(hidden, c2, h, w)      # [K, c, h, w]
    w1 = w1.transpose(2, 3, 1, 0).reshape(h, w * c2, hidden)  # [h, w*c2+c, K]
    return {"w1": w1, "b1": np.asarray(dm["b1"]),
            "w2": np.asarray(dm["w2"]).T, "b2": np.asarray(dm["b2"])}


def _finalize_dm(raw):
    """Pad hidden / logits widths to 128 lanes (lane-dense stores & output DMA)."""
    h, wc2, hidden = raw["w1"].shape
    ncls = raw["w2"].shape[1]
    hid_p = max(LANE, _round_up(hidden, LANE))
    out_p = max(LANE, _round_up(ncls, LANE))
    w1 = np.zeros((h, wc2, hid_p), np.float32); w1[:, :, :hidden] = raw["w1"]
    b1 = np.zeros((1, hid_p), np.float32);      b1[0, :hidden] = raw["b1"]
    w2 = np.zeros((hid_p, out_p), np.float32);  w2[:hidden, :ncls] = raw["w2"]
    b2 = np.zeros((1, out_p), np.float32);      b2[0, :ncls] = raw["b2"]
    return {"w1": jnp.asarray(w1, jnp.bfloat16), "b1": jnp.asarray(b1),
            "w2": jnp.asarray(w2, jnp.bfloat16), "b2": jnp.asarray(b2)}


def pack_typhon_params(torch_params, dset_names, h, w):
    fe = torch_params["fe"]
    k1 = np.asarray(fe["conv1_w"]); b1 = np.asarray(fe["conv1_b"])
    k2 = np.asarray(fe["conv2_w"]); b2 = np.asarray(fe["conv2_b"])
    c2 = k2.shape[0]

    conv = {
        "w1": jnp.asarray(_pack_conv(k1, w), jnp.bfloat16),
        "b1": jnp.asarray(np.tile(b1, w).reshape(1, -1), jnp.float32),
        "w2": jnp.asarray(_pack_conv(k2, w), jnp.bfloat16),
        "b2": jnp.asarray(np.tile(b2, w).reshape(1, -1), jnp.float32),
    }

    raws = {n: _pack_dm_raw(torch_params["dms"][n], c2, h, w) for n in dset_names}
    dms = {n: _finalize_dm(raws[n]) for n in dset_names}

    # "All heads" DM: concat hidden columns, block-diagonal logits, so one
    # fused kernel launch evaluates every dataset head at once.
    hidden = raws[dset_names[0]]["w1"].shape[2]
    ncls = raws[dset_names[0]]["w2"].shape[1]
    nh = len(dset_names)
    w1_all = np.concatenate([raws[n]["w1"] for n in dset_names], axis=2)
    b1_all = np.concatenate([raws[n]["b1"] for n in dset_names], axis=0)
    w2_all = np.zeros((nh * hidden, nh * ncls), np.float32)
    for i, n in enumerate(dset_names):
        w2_all[i * hidden:(i + 1) * hidden, i * ncls:(i + 1) * ncls] = raws[n]["w2"]
    b2_all = np.concatenate([raws[n]["b2"] for n in dset_names], axis=0)
    dms_all = _finalize_dm({"w1": w1_all, "b1": b1_all, "w2": w2_all, "b2": b2_all})

    return {"conv": conv, "dms": dms, "dms_all": dms_all,
            "dset_names": tuple(dset_names), "num_classes": ncls}


# -----------------------------------------------------------------------------
# TyphonModel.forward equivalents
# -----------------------------------------------------------------------------
def typhon_forward(packed, x, dset_name):
    """forward(x, dset_name): one fused Pallas kernel launch."""
    out = _fused_forward(x, packed["conv"], packed["dms"][dset_name])
    return out[:, :packed["num_classes"]]


def typhon_forward_all(packed, x):
    """Evaluate every decision-maker head with a single fused kernel launch."""
    out = _fused_forward(x, packed["conv"], packed["dms_all"])
    ncls = packed["num_classes"]
    return {name: out[:, i * ncls:(i + 1) * ncls]
            for i, name in enumerate(packed["dset_names"])}


def typhon_forward_reference(torch_params, x, dset_name):
    """Pure-JAX f32 reference of the PyTorch forward (eval mode)."""
    fe = torch_params["fe"]
    dn = ("NCHW", "OIHW", "NCHW")
    y = lax.conv_general_dilated(x, fe["conv1_w"], (1, 1), "SAME",
                                 dimension_numbers=dn)
    y = jnp.maximum(y + fe["conv1_b"][None, :, None, None], 0.0)
    y = lax.conv_general_dilated(y, fe["conv2_w"], (1, 1), "SAME",
                                 dimension_numbers=dn)
    y = jnp.maximum(y + fe["conv2_b"][None, :, None, None], 0.0)
    y = y.reshape(y.shape[0], -1)
    dm = torch_params["dms"][dset_name]
    h = jnp.maximum(y @ dm["w1"].T + dm["b1"][None, :], 0.0)
    return h @ dm["w2"].T + dm["b2"][None, :]


# -----------------------------------------------------------------------------
if __name__ == "__main__":
    key = jax.random.PRNGKey(0)
    k_param, k_x = jax.random.split(key)

    N, CIN, H, W = 2, 4, 16, 16
    dset_names = ["dset_a", "dset_b"]

    torch_params = init_typhon_params(k_param, CIN, H, W, dset_names)
    packed = pack_typhon_params(torch_params, dset_names, H, W)
    x = jax.random.normal(k_x, (N, CIN, H, W), jnp.float32)

    # Both decision-maker heads with ONE fused kernel launch.
    outs = typhon_forward_all(packed, x)
    # Per-head path (still a single fused launch), as in the original forward.
    out_a = typhon_forward(packed, x, "dset_a")
    jax.block_until_ready((outs, out_a))

    assert outs["dset_a"].shape == (N, 10) and outs["dset_b"].shape == (N, 10)
    assert out_a.shape == (N, 10)

    # Batched-heads path must agree with the per-head path.
    assert jnp.allclose(out_a, outs["dset_a"], atol=1e-2, rtol=1e-2)

    # Sanity check vs a pure-JAX f32 reference (bf16 matmul inputs => loose tol).
    ref_a = typhon_forward_reference(torch_params, x, "dset_a")
    ref_b = typhon_forward_reference(torch_params, x, "dset_b")
    assert jnp.allclose(out_a, ref_a, atol=0.3, rtol=0.05)
    assert jnp.allclose(outs["dset_b"], ref_b, atol=0.3, rtol=0.05)

    print("KERNEL_OK")
</pallas_src>

<mosaic_0001>
module attributes {stable_mosaic.version = 11 : i64} {
  func.func @_typhon_fused_kernel(%arg0: i32, %arg1: memref<2x18x64xbf16, #tpu.memory_space<vmem>>, %arg2: memref<3x64x128xbf16, #tpu.memory_space<vmem>>, %arg3: memref<1x128xf32, #tpu.memory_space<vmem>>, %arg4: memref<3x128x256xbf16, #tpu.memory_space<vmem>>, %arg5: memref<1x256xf32, #tpu.memory_space<vmem>>, %arg6: memref<16x256x128xbf16, #tpu.memory_space<vmem>>, %arg7: memref<1x128xf32, #tpu.memory_space<vmem>>, %arg8: memref<128x128xbf16, #tpu.memory_space<vmem>>, %arg9: memref<1x128xf32, #tpu.memory_space<vmem>>, %arg10: memref<2x128xf32, #tpu.memory_space<vmem>>, %arg11: memref<2x18x128xbf16, #tpu.memory_space<vmem>>, %arg12: memref<2x16x256xbf16, #tpu.memory_space<vmem>>) attributes {dimension_semantics = [#tpu.dimension_semantics<parallel>], iteration_bounds = array<i64: 1>, scalar_prefetch = 0 : i64, scratch_operands = 2 : i64, tpu.core_type = #tpu.core_type<tc>, window_params = [{transform_indices = @transform_0, window_bounds = array<i64: 2, 18, 64>}, {pipeline_mode = #tpu.pipeline_mode<synchronous>, transform_indices = @transform_1, window_bounds = array<i64: 3, 64, 128>}, {pipeline_mode = #tpu.pipeline_mode<synchronous>, transform_indices = @transform_2, window_bounds = array<i64: 1, 128>}, {pipeline_mode = #tpu.pipeline_mode<synchronous>, transform_indices = @transform_3, window_bounds = array<i64: 3, 128, 256>}, {pipeline_mode = #tpu.pipeline_mode<synchronous>, transform_indices = @transform_4, window_bounds = array<i64: 1, 256>}, {pipeline_mode = #tpu.pipeline_mode<synchronous>, transform_indices = @transform_5, window_bounds = array<i64: 16, 256, 128>}, {pipeline_mode = #tpu.pipeline_mode<synchronous>, transform_indices = @transform_6, window_bounds = array<i64: 1, 128>}, {pipeline_mode = #tpu.pipeline_mode<synchronous>, transform_indices = @transform_7, window_bounds = array<i64: 128, 128>}, {pipeline_mode = #tpu.pipeline_mode<synchronous>, transform_indices = @transform_8, window_bounds = array<i64: 1, 128>}, {transform_indices = @transform_9, window_bounds = array<i64: 2, 128>}]} {
    %cst = arith.constant 0.000000e+00 : f32
    %0 = vector.broadcast %cst : f32 to vector<32x128xf32>
    %c0 = arith.constant 0 : index
    %c0_0 = arith.constant 0 : index
    %c0_1 = arith.constant 0 : index
    %1 = vector.load %arg1[%c0, %c0_0, %c0_1] : memref<2x18x64xbf16, #tpu.memory_space<vmem>>, vector<2x16x64xbf16>
    %2 = vector.shape_cast %1 : vector<2x16x64xbf16> to vector<32x64xbf16>
    %c0_2 = arith.constant 0 : index
    %c0_3 = arith.constant 0 : index
    %c0_4 = arith.constant 0 : index
    %3 = vector.load %arg2[%c0_2, %c0_3, %c0_4] : memref<3x64x128xbf16, #tpu.memory_space<vmem>>, vector<1x64x128xbf16>
    %4 = vector.shape_cast %3 : vector<1x64x128xbf16> to vector<64x128xbf16>
    %cst_5 = arith.constant dense<0.000000e+00> : vector<32x128xf32>
    %5 = tpu.matmul %2, %4, %cst_5 {dimension_numbers = #tpu.dot_dimension_numbers<[1], [0], [0], [1], [0, 0, 1, 1], [], []>} : vector<32x64xbf16>, vector<64x128xbf16>, vector<32x128xf32> -> vector<32x128xf32>
    %6 = arith.addf %0, %5 : vector<32x128xf32>
    %c0_6 = arith.constant 0 : index
    %c1 = arith.constant 1 : index
    %c0_7 = arith.constant 0 : index
    %7 = vector.load %arg1[%c0_6, %c1, %c0_7] : memref<2x18x64xbf16, #tpu.memory_space<vmem>>, vector<2x16x64xbf16>
    %8 = vector.shape_cast %7 : vector<2x16x64xbf16> to vector<32x64xbf16>
    %c1_8 = arith.constant 1 : index
    %c0_9 = arith.constant 0 : index
    %c0_10 = arith.constant 0 : index
    %9 = vector.load %arg2[%c1_8, %c0_9, %c0_10] : memref<3x64x128xbf16, #tpu.memory_space<vmem>>, vector<1x64x128xbf16>
    %10 = vector.shape_cast %9 : vector<1x64x128xbf16> to vector<64x128xbf16>
    %cst_11 = arith.constant dense<0.000000e+00> : vector<32x128xf32>
    %11 = tpu.matmul %8, %10, %cst_11 {dimension_numbers = #tpu.dot_dimension_numbers<[1], [0], [0], [1], [0, 0, 1, 1], [], []>} : vector<32x64xbf16>, vector<64x128xbf16>, vector<32x128xf32> -> vector<32x128xf32>
    %12 = arith.addf %6, %11 : vector<32x128xf32>
    %c0_12 = arith.constant 0 : index
    %c2 = arith.constant 2 : index
    %c0_13 = arith.constant 0 : index
    %13 = vector.load %arg1[%c0_12, %c2, %c0_13] : memref<2x18x64xbf16, #tpu.memory_space<vmem>>, vector<2x16x64xbf16>
    %14 = vector.shape_cast %13 : vector<2x16x64xbf16> to vector<32x64xbf16>
    %c2_14 = arith.constant 2 : index
    %c0_15 = arith.constant 0 : index
    %c0_16 = arith.constant 0 : index
    %15 = vector.load %arg2[%c2_14, %c0_15, %c0_16] : memref<3x64x128xbf16, #tpu.memory_space<vmem>>, vector<1x64x128xbf16>
    %16 = vector.shape_cast %15 : vector<1x64x128xbf16> to vector<64x128xbf16>
    %cst_17 = arith.constant dense<0.000000e+00> : vector<32x128xf32>
    %17 = tpu.matmul %14, %16, %cst_17 {dimension_numbers = #tpu.dot_dimension_numbers<[1], [0], [0], [1], [0, 0, 1, 1], [], []>} : vector<32x64xbf16>, vector<64x128xbf16>, vector<32x128xf32> -> vector<32x128xf32>
    %18 = arith.addf %12, %17 : vector<32x128xf32>
    %c0_18 = arith.constant 0 : index
    %c0_19 = arith.constant 0 : index
    %19 = vector.load %arg3[%c0_18, %c0_19] : memref<1x128xf32, #tpu.memory_space<vmem>>, vector<1x128xf32>
    %20 = vector.broadcast %19 : vector<1x128xf32> to vector<32x128xf32>
    %21 = arith.addf %18, %20 : vector<32x128xf32>
    %cst_20 = arith.constant 0.000000e+00 : f32
    %22 = vector.broadcast %cst_20 : f32 to vector<32x128xf32>
    %23 = arith.maximumf %21, %22 : vector<32x128xf32>
    %cst_21 = arith.constant 0.000000e+00 : bf16
    %24 = vector.broadcast %cst_21 : bf16 to vector<2x1x128xbf16>
    %c0_22 = arith.constant 0 : index
    %c0_23 = arith.constant 0 : index
    %c0_24 = arith.constant 0 : index
    %25 = vector.load %arg11[%c0_22, %c0_23, %c0_24] : memref<2x18x128xbf16, #tpu.memory_space<vmem>>, vector<2x1x128xbf16>
    tpu.vector_store %arg11[%c0_22, %c0_23, %c0_24], %24 {strides = array<i32>} : memref<2x18x128xbf16, #tpu.memory_space<vmem>>, vector<2x1x128xbf16>,
    %cst_25 = arith.constant 0.000000e+00 : bf16
    %26 = vector.broadcast %cst_25 : bf16 to vector<2x1x128xbf16>
    %c0_26 = arith.constant 0 : index
    %c17 = arith.constant 17 : index
    %c0_27 = arith.constant 0 : index
    %27 = vector.load %arg11[%c0_26, %c17, %c0_27] : memref<2x18x128xbf16, #tpu.memory_space<vmem>>, vector<2x1x128xbf16>
    tpu.vector_store %arg11[%c0_26, %c17, %c0_27], %26 {strides = array<i32>} : memref<2x18x128xbf16, #tpu.memory_space<vmem>>, vector<2x1x128xbf16>,
    %28 = vector.shape_cast %23 : vector<32x128xf32> to vector<2x16x128xf32>
    %29 = arith.truncf %28 : vector<2x16x128xf32> to vector<2x16x128xbf16>
    %c0_28 = arith.constant 0 : index
    %c1_29 = arith.constant 1 : index
    %c0_30 = arith.constant 0 : index
    %30 = vector.load %arg11[%c0_28, %c1_29, %c0_30] : memref<2x18x128xbf16, #tpu.memory_space<vmem>>, vector<2x16x128xbf16>
    tpu.vector_store %arg11[%c0_28, %c1_29, %c0_30], %29 {strides = array<i32>} : memref<2x18x128xbf16, #tpu.memory_space<vmem>>, vector<2x16x128xbf16>,
    %cst_31 = arith.constant 0.000000e+00 : f32
    %31 = vector.broadcast %cst_31 : f32 to vector<32x256xf32>
    %c0_32 = arith.constant 0 : index
    %c0_33 = arith.constant 0 : index
    %c0_34 = arith.constant 0 : index
    %32 = vector.load %arg11[%c0_32, %c0_33, %c0_34] : memref<2x18x128xbf16, #tpu.memory_space<vmem>>, vector<2x16x128xbf16>
    %33 = vector.shape_cast %32 : vector<2x16x128xbf16> to vector<32x128xbf16>
    %c0_35 = arith.constant 0 : index
    %c0_36 = arith.constant 0 : index
    %c0_37 = arith.constant 0 : index
    %34 = vector.load %arg4[%c0_35, %c0_36, %c0_37] : memref<3x128x256xbf16, #tpu.memory_space<vmem>>, vector<1x128x256xbf16>
    %35 = vector.shape_cast %34 : vector<1x128x256xbf16> to vector<128x256xbf16>
    %cst_38 = arith.constant dense<0.000000e+00> : vector<32x256xf32>
    %36 = tpu.matmul %33, %35, %cst_38 {dimension_numbers = #tpu.dot_dimension_numbers<[1], [0], [0], [1], [0, 0, 1, 1], [], []>} : vector<32x128xbf16>, vector<128x256xbf16>, vector<32x256xf32> -> vector<32x256xf32>
    %37 = arith.addf %31, %36 : vector<32x256xf32>
    %c0_39 = arith.constant 0 : index
    %c1_40 = arith.constant 1 : index
    %c0_41 = arith.constant 0 : index
    %38 = vector.load %arg11[%c0_39, %c1_40, %c0_41] : memref<2x18x128xbf16, #tpu.memory_space<vmem>>, vector<2x16x128xbf16>
    %39 = vector.shape_cast %38 : vector<2x16x128xbf16> to vector<32x128xbf16>
    %c1_42 = arith.constant 1 : index
    %c0_43 = arith.constant 0 : index
    %c0_44 = arith.constant 0 : index
    %40 = vector.load %arg4[%c1_42, %c0_43, %c0_44] : memref<3x128x256xbf16, #tpu.memory_space<vmem>>, vector<1x128x256xbf16>
    %41 = vector.shape_cast %40 : vector<1x128x256xbf16> to vector<128x256xbf16>
    %cst_45 = arith.constant dense<0.000000e+00> : vector<32x256xf32>
    %42 = tpu.matmul %39, %41, %cst_45 {dimension_numbers = #tpu.dot_dimension_numbers<[1], [0], [0], [1], [0, 0, 1, 1], [], []>} : vector<32x128xbf16>, vector<128x256xbf16>, vector<32x256xf32> -> vector<32x256xf32>
    %43 = arith.addf %37, %42 : vector<32x256xf32>
    %c0_46 = arith.constant 0 : index
    %c2_47 = arith.constant 2 : index
    %c0_48 = arith.constant 0 : index
    %44 = vector.load %arg11[%c0_46, %c2_47, %c0_48] : memref<2x18x128xbf16, #tpu.memory_space<vmem>>, vector<2x16x128xbf16>
    %45 = vector.shape_cast %44 : vector<2x16x128xbf16> to vector<32x128xbf16>
    %c2_49 = arith.constant 2 : index
    %c0_50 = arith.constant 0 : index
    %c0_51 = arith.constant 0 : index
    %46 = vector.load %arg4[%c2_49, %c0_50, %c0_51] : memref<3x128x256xbf16, #tpu.memory_space<vmem>>, vector<1x128x256xbf16>
    %47 = vector.shape_cast %46 : vector<1x128x256xbf16> to vector<128x256xbf16>
    %cst_52 = arith.constant dense<0.000000e+00> : vector<32x256xf32>
    %48 = tpu.matmul %45, %47, %cst_52 {dimension_numbers = #tpu.dot_dimension_numbers<[1], [0], [0], [1], [0, 0, 1, 1], [], []>} : vector<32x128xbf16>, vector<128x256xbf16>, vector<32x256xf32> -> vector<32x256xf32>
    %49 = arith.addf %43, %48 : vector<32x256xf32>
    %c0_53 = arith.constant 0 : index
    %c0_54 = arith.constant 0 : index
    %50 = vector.load %arg5[%c0_53, %c0_54] : memref<1x256xf32, #tpu.memory_space<vmem>>, vector<1x256xf32>
    %51 = vector.broadcast %50 : vector<1x256xf32> to vector<32x256xf32>
    %52 = arith.addf %49, %51 : vector<32x256xf32>
    %cst_55 = arith.constant 0.000000e+00 : f32
    %53 = vector.broadcast %cst_55 : f32 to vector<32x256xf32>
    %54 = arith.maximumf %52, %53 : vector<32x256xf32>
    %55 = vector.shape_cast %54 : vector<32x256xf32> to vector<2x16x256xf32>
    %56 = arith.truncf %55 : vector<2x16x256xf32> to vector<2x16x256xbf16>
    %c0_56 = arith.constant 0 : index
    %c0_57 = arith.constant 0 : index
    %c0_58 = arith.constant 0 : index
    %57 = vector.load %arg12[%c0_56, %c0_57, %c0_58] : memref<2x16x256xbf16, #tpu.memory_space<vmem>>, vector<2x16x256xbf16>
    tpu.vector_store %arg12[%c0_56, %c0_57, %c0_58], %56 {strides = array<i32>} : memref<2x16x256xbf16, #tpu.memory_space<vmem>>, vector<2x16x256xbf16>,
    %cst_59 = arith.constant 0.000000e+00 : f32
    %58 = vector.broadcast %cst_59 : f32 to vector<2x128xf32>
    %c0_60 = arith.constant 0 : index
    %c0_61 = arith.constant 0 : index
    %c0_62 = arith.constant 0 : index
    %59 = vector.load %arg12[%c0_60, %c0_61, %c0_62] : memref<2x16x256xbf16, #tpu.memory_space<vmem>>, vector<2x1x256xbf16>
    %60 = vector.shape_cast %59 : vector<2x1x256xbf16> to vector<2x256xbf16>
    %c0_63 = arith.constant 0 : index
    %c0_64 = arith.constant 0 : index
    %c0_65 = arith.constant 0 : index
    %61 = vector.load %arg6[%c0_63, %c0_64, %c0_65] : memref<16x256x128xbf16, #tpu.memory_space<vmem>>, vector<1x256x128xbf16>
    %62 = vector.shape_cast %61 : vector<1x256x128xbf16> to vector<256x128xbf16>
    %cst_66 = arith.constant dense<0.000000e+00> : vector<2x128xf32>
    %63 = tpu.matmul %60, %62, %cst_66 {dimension_numbers = #tpu.dot_dimension_numbers<[1], [0], [0], [1], [0, 0, 1, 1], [], []>} : vector<2x256xbf16>, vector<256x128xbf16>, vector<2x128xf32> -> vector<2x128xf32>
    %64 = arith.addf %58, %63 : vector<2x128xf32>
    %c0_67 = arith.constant 0 : index
    %c1_68 = arith.constant 1 : index
    %c0_69 = arith.constant 0 : index
    %65 = vector.load %arg12[%c0_67, %c1_68, %c0_69] : memref<2x16x256xbf16, #tpu.memory_space<vmem>>, vector<2x1x256xbf16>
    %66 = vector.shape_cast %65 : vector<2x1x256xbf16> to vector<2x256xbf16>
    %c1_70 = arith.constant 1 : index
    %c0_71 = arith.constant 0 : index
    %c0_72 = arith.constant 0 : index
    %67 = vector.load %arg6[%c1_70, %c0_71, %c0_72] : memref<16x256x128xbf16, #tpu.memory_space<vmem>>, vector<1x256x128xbf16>
    %68 = vector.shape_cast %67 : vector<1x256x128xbf16> to vector<256x128xbf16>
    %cst_73 = arith.constant dense<0.000000e+00> : vector<2x128xf32>
    %69 = tpu.matmul %66, %68, %cst_73 {dimension_numbers = #tpu.dot_dimension_numbers<[1], [0], [0], [1], [0, 0, 1, 1], [], []>} : vector<2x256xbf16>, vector<256x128xbf16>, vector<2x128xf32> -> vector<2x128xf32>
    %70 = arith.addf %64, %69 : vector<2x128xf32>
    %c0_74 = arith.constant 0 : index
    %c2_75 = arith.constant 2 : index
    %c0_76 = arith.constant 0 : index
    %71 = vector.load %arg12[%c0_74, %c2_75, %c0_76] : memref<2x16x256xbf16, #tpu.memory_space<vmem>>, vector<2x1x256xbf16>
    %72 = vector.shape_cast %71 : vector<2x1x256xbf16> to vector<2x256xbf16>
    %c2_77 = arith.constant 2 : index
    %c0_78 = arith.constant 0 : index
    %c0_79 = arith.constant 0 : index
    %73 = vector.load %arg6[%c2_77, %c0_78, %c0_79] : memref<16x256x128xbf16, #tpu.memory_space<vmem>>, vector<1x256x128xbf16>
    %74 = vector.shape_cast %73 : vector<1x256x128xbf16> to vector<256x128xbf16>
    %cst_80 = arith.constant dense<0.000000e+00> : vector<2x128xf32>
    %75 = tpu.matmul %72, %74, %cst_80 {dimension_numbers = #tpu.dot_dimension_numbers<[1], [0], [0], [1], [0, 0, 1, 1], [], []>} : vector<2x256xbf16>, vector<256x128xbf16>, vector<2x128xf32> -> vector<2x128xf32>
    %76 = arith.addf %70, %75 : vector<2x128xf32>
    %c0_81 = arith.constant 0 : index
    %c3 = arith.constant 3 : index
    %c0_82 = arith.constant 0 : index
    %77 = vector.load %arg12[%c0_81, %c3, %c0_82] : memref<2x16x256xbf16, #tpu.memory_space<vmem>>, vector<2x1x256xbf16>
    %78 = vector.shape_cast %77 : vector<2x1x256xbf16> to vector<2x256xbf16>
    %c3_83 = arith.constant 3 : index
    %c0_84 = arith.constant 0 : index
    %c0_85 = arith.constant 0 : index
    %79 = vector.load %arg6[%c3_83, %c0_84, %c0_85] : memref<16x256x128xbf16, #tpu.memory_space<vmem>>, vector<1x256x128xbf16>
    %80 = vector.shape_cast %79 : vector<1x256x128xbf16> to vector<256x128xbf16>
    %cst_86 = arith.constant dense<0.000000e+00> : vector<2x128xf32>
    %81 = tpu.matmul %78, %80, %cst_86 {dimension_numbers = #tpu.dot_dimension_numbers<[1], [0], [0], [1], [0, 0, 1, 1], [], []>} : vector<2x256xbf16>, vector<256x128xbf16>, vector<2x128xf32> -> vector<2x128xf32>
    %82 = arith.addf %76, %81 : vector<2x128xf32>
    %c0_87 = arith.constant 0 : index
    %c4 = arith.constant 4 : index
    %c0_88 = arith.constant 0 : index
    %83 = vector.load %arg12[%c0_87, %c4, %c0_88] : memref<2x16x256xbf16, #tpu.memory_space<vmem>>, vector<2x1x256xbf16>
    %84 = vector.shape_cast %83 : vector<2x1x256xbf16> to vector<2x256xbf16>
    %c4_89 = arith.constant 4 : index
    %c0_90 = arith.constant 0 : index
    %c0_91 = arith.constant 0 : index
    %85 = vector.load %arg6[%c4_89, %c0_90, %c0_91] : memref<16x256x128xbf16, #tpu.memory_space<vmem>>, vector<1x256x128xbf16>
    %86 = vector.shape_cast %85 : vector<1x256x128xbf16> to vector<256x128xbf16>
    %cst_92 = arith.constant dense<0.000000e+00> : vector<2x128xf32>
    %87 = tpu.matmul %84, %86, %cst_92 {dimension_numbers = #tpu.dot_dimension_numbers<[1], [0], [0], [1], [0, 0, 1, 1], [], []>} : vector<2x256xbf16>, vector<256x128xbf16>, vector<2x128xf32> -> vector<2x128xf32>
    %88 = arith.addf %82, %87 : vector<2x128xf32>
    %c0_93 = arith.constant 0 : index
    %c5 = arith.constant 5 : index
    %c0_94 = arith.constant 0 : index
    %89 = vector.load %arg12[%c0_93, %c5, %c0_94] : memref<2x16x256xbf16, #tpu.memory_space<vmem>>, vector<2x1x256xbf16>
    %90 = vector.shape_cast %89 : vector<2x1x256xbf16> to vector<2x256xbf16>
    %c5_95 = arith.constant 5 : index
    %c0_96 = arith.constant 0 : index
    %c0_97 = arith.constant 0 : index
    %91 = vector.load %arg6[%c5_95, %c0_96, %c0_97] : memref<16x256x128xbf16, #tpu.memory_space<vmem>>, vector<1x256x128xbf16>
    %92 = vector.shape_cast %91 : vector<1x256x128xbf16> to vector<256x128xbf16>
    %cst_98 = arith.constant dense<0.000000e+00> : vector<2x128xf32>
    %93 = tpu.matmul %90, %92, %cst_98 {dimension_numbers = #tpu.dot_dimension_numbers<[1], [0], [0], [1], [0, 0, 1, 1], [], []>} : vector<2x256xbf16>, vector<256x128xbf16>, vector<2x128xf32> -> vector<2x128xf32>
    %94 = arith.addf %88, %93 : vector<2x128xf32>
    %c0_99 = arith.constant 0 : index
    %c6 = arith.constant 6 : index
    %c0_100 = arith.constant 0 : index
    %95 = vector.load %arg12[%c0_99, %c6, %c0_100] : memref<2x16x256xbf16, #tpu.memory_space<vmem>>, vector<2x1x256xbf16>
    %96 = vector.shape_cast %95 : vector<2x1x256xbf16> to vector<2x256xbf16>
    %c6_101 = arith.constant 6 : index
    %c0_102 = arith.constant 0 : index
    %c0_103 = arith.constant 0 : index
    %97 = vector.load %arg6[%c6_101, %c0_102, %c0_103] : memref<16x256x128xbf16, #tpu.memory_space<vmem>>, vector<1x256x128xbf16>
    %98 = vector.shape_cast %97 : vector<1x256x128xbf16> to vector<256x128xbf16>
    %cst_104 = arith.constant dense<0.000000e+00> : vector<2x128xf32>
    %99 = tpu.matmul %96, %98, %cst_104 {dimension_numbers = #tpu.dot_dimension_numbers<[1], [0], [0], [1], [0, 0, 1, 1], [], []>} : vector<2x256xbf16>, vector<256x128xbf16>, vector<2x128xf32> -> vector<2x128xf32>
    %100 = arith.addf %94, %99 : vector<2x128xf32>
    %c0_105 = arith.constant 0 : index
    %c7 = arith.constant 7 : index
    %c0_106 = arith.constant 0 : index
    %101 = vector.load %arg12[%c0_105, %c7, %c0_106] : memref<2x16x256xbf16, #tpu.memory_space<vmem>>, vector<2x1x256xbf16>
    %102 = vector.shape_cast %101 : vector<2x1x256xbf16> to vector<2x256xbf16>
    %c7_107 = arith.constant 7 : index
    %c0_108 = arith.constant 0 : index
    %c0_109 = arith.constant 0 : index
    %103 = vector.load %arg6[%c7_107, %c0_108, %c0_109] : memref<16x256x128xbf16, #tpu.memory_space<vmem>>, vector<1x256x128xbf16>
    %104 = vector.shape_cast %103 : vector<1x256x128xbf16> to vector<256x128xbf16>
    %cst_110 = arith.constant dense<0.000000e+00> : vector<2x128xf32>
    %105 = tpu.matmul %102, %104, %cst_110 {dimension_numbers = #tpu.dot_dimension_numbers<[1], [0], [0], [1], [0, 0, 1, 1], [], []>} : vector<2x256xbf16>, vector<256x128xbf16>, vector<2x128xf32> -> vector<2x128xf32>
    %106 = arith.addf %100, %105 : vector<2x128xf32>
    %c0_111 = arith.constant 0 : index
    %c8 = arith.constant 8 : index
    %c0_112 = arith.constant 0 : index
    %107 = vector.load %arg12[%c0_111, %c8, %c0_112] : memref<2x16x256xbf16, #tpu.memory_space<vmem>>, vector<2x1x256xbf16>
    %108 = vector.shape_cast %107 : vector<2x1x256xbf16> to vector<2x256xbf16>
    %c8_113 = arith.constant 8 : index
    %c0_114 = arith.constant 0 : index
    %c0_115 = arith.constant 0 : index
    %109 = vector.load %arg6[%c8_113, %c0_114, %c0_115] : memref<16x256x128xbf16, #tpu.memory_space<vmem>>, vector<1x256x128xbf16>
    %110 = vector.shape_cast %109 : vector<1x256x128xbf16> to vector<256x128xbf16>
    %cst_116 = arith.constant dense<0.000000e+00> : vector<2x128xf32>
    %111 = tpu.matmul %108, %110, %cst_116 {dimension_numbers = #tpu.dot_dimension_numbers<[1], [0], [0], [1], [0, 0, 1, 1], [], []>} : vector<2x256xbf16>, vector<256x128xbf16>, vector<2x128xf32> -> vector<2x128xf32>
    %112 = arith.addf %106, %111 : vector<2x128xf32>
    %c0_117 = arith.constant 0 : index
    %c9 = arith.constant 9 : index
    %c0_118 = arith.constant 0 : index
    %113 = vector.load %arg12[%c0_117, %c9, %c0_118] : memref<2x16x256xbf16, #tpu.memory_space<vmem>>, vector<2x1x256xbf16>
    %114 = vector.shape_cast %113 : vector<2x1x256xbf16> to vector<2x256xbf16>
    %c9_119 = arith.constant 9 : index
    %c0_120 = arith.constant 0 : index
    %c0_121 = arith.constant 0 : index
    %115 = vector.load %arg6[%c9_119, %c0_120, %c0_121] : memref<16x256x128xbf16, #tpu.memory_space<vmem>>, vector<1x256x128xbf16>
    %116 = vector.shape_cast %115 : vector<1x256x128xbf16> to vector<256x128xbf16>
    %cst_122 = arith.constant dense<0.000000e+00> : vector<2x128xf32>
    %117 = tpu.matmul %114, %116, %cst_122 {dimension_numbers = #tpu.dot_dimension_numbers<[1], [0], [0], [1], [0, 0, 1, 1], [], []>} : vector<2x256xbf16>, vector<256x128xbf16>, vector<2x128xf32> -> vector<2x128xf32>
    %118 = arith.addf %112, %117 : vector<2x128xf32>
    %c0_123 = arith.constant 0 : index
    %c10 = arith.constant 10 : index
    %c0_124 = arith.constant 0 : index
    %119 = vector.load %arg12[%c0_123, %c10, %c0_124] : memref<2x16x256xbf16, #tpu.memory_space<vmem>>, vector<2x1x256xbf16>
    %120 = vector.shape_cast %119 : vector<2x1x256xbf16> to vector<2x256xbf16>
    %c10_125 = arith.constant 10 : index
    %c0_126 = arith.constant 0 : index
    %c0_127 = arith.constant 0 : index
    %121 = vector.load %arg6[%c10_125, %c0_126, %c0_127] : memref<16x256x128xbf16, #tpu.memory_space<vmem>>, vector<1x256x128xbf16>
    %122 = vector.shape_cast %121 : vector<1x256x128xbf16> to vector<256x128xbf16>
    %cst_128 = arith.constant dense<0.000000e+00> : vector<2x128xf32>
    %123 = tpu.matmul %120, %122, %cst_128 {dimension_numbers = #tpu.dot_dimension_numbers<[1], [0], [0], [1], [0, 0, 1, 1], [], []>} : vector<2x256xbf16>, vector<256x128xbf16>, vector<2x128xf32> -> vector<2x128xf32>
    %124 = arith.addf %118, %123 : vector<2x128xf32>
    %c0_129 = arith.constant 0 : index
    %c11 = arith.constant 11 : index
    %c0_130 = arith.constant 0 : index
    %125 = vector.load %arg12[%c0_129, %c11, %c0_130] : memref<2x16x256xbf16, #tpu.memory_space<vmem>>, vector<2x1x256xbf16>
    %126 = vector.shape_cast %125 : vector<2x1x256xbf16> to vector<2x256xbf16>
    %c11_131 = arith.constant 11 : index
    %c0_132 = arith.constant 0 : index
    %c0_133 = arith.constant 0 : index
    %127 = vector.load %arg6[%c11_131, %c0_132, %c0_133] : memref<16x256x128xbf16, #tpu.memory_space<vmem>>, vector<1x256x128xbf16>
    %128 = vector.shape_cast %127 : vector<1x256x128xbf16> to vector<256x128xbf16>
    %cst_134 = arith.constant dense<0.000000e+00> : vector<2x128xf32>
    %129 = tpu.matmul %126, %128, %cst_134 {dimension_numbers = #tpu.dot_dimension_numbers<[1], [0], [0], [1], [0, 0, 1, 1], [], []>} : vector<2x256xbf16>, vector<256x128xbf16>, vector<2x128xf32> -> vector<2x128xf32>
    %130 = arith.addf %124, %129 : vector<2x128xf32>
    %c0_135 = arith.constant 0 : index
    %c12 = arith.constant 12 : index
    %c0_136 = arith.constant 0 : index
    %131 = vector.load %arg12[%c0_135, %c12, %c0_136] : memref<2x16x256xbf16, #tpu.memory_space<vmem>>, vector<2x1x256xbf16>
    %132 = vector.shape_cast %131 : vector<2x1x256xbf16> to vector<2x256xbf16>
    %c12_137 = arith.constant 12 : index
    %c0_138 = arith.constant 0 : index
    %c0_139 = arith.constant 0 : index
    %133 = vector.load %arg6[%c12_137, %c0_138, %c0_139] : memref<16x256x128xbf16, #tpu.memory_space<vmem>>, vector<1x256x128xbf16>
    %134 = vector.shape_cast %133 : vector<1x256x128xbf16> to vector<256x128xbf16>
    %cst_140 = arith.constant dense<0.000000e+00> : vector<2x128xf32>
    %135 = tpu.matmul %132, %134, %cst_140 {dimension_numbers = #tpu.dot_dimension_numbers<[1], [0], [0], [1], [0, 0, 1, 1], [], []>} : vector<2x256xbf16>, vector<256x128xbf16>, vector<2x128xf32> -> vector<2x128xf32>
    %136 = arith.addf %130, %135 : vector<2x128xf32>
    %c0_141 = arith.constant 0 : index
    %c13 = arith.constant 13 : index
    %c0_142 = arith.constant 0 : index
    %137 = vector.load %arg12[%c0_141, %c13, %c0_142] : memref<2x16x256xbf16, #tpu.memory_space<vmem>>, vector<2x1x256xbf16>
    %138 = vector.shape_cast %137 : vector<2x1x256xbf16> to vector<2x256xbf16>
    %c13_143 = arith.constant 13 : index
    %c0_144 = arith.constant 0 : index
    %c0_145 = arith.constant 0 : index
    %139 = vector.load %arg6[%c13_143, %c0_144, %c0_145] : memref<16x256x128xbf16, #tpu.memory_space<vmem>>, vector<1x256x128xbf16>
    %140 = vector.shape_cast %139 : vector<1x256x128xbf16> to vector<256x128xbf16>
    %cst_146 = arith.constant dense<0.000000e+00> : vector<2x128xf32>
    %141 = tpu.matmul %138, %140, %cst_146 {dimension_numbers = #tpu.dot_dimension_numbers<[1], [0], [0], [1], [0, 0, 1, 1], [], []>} : vector<2x256xbf16>, vector<256x128xbf16>, vector<2x128xf32> -> vector<2x128xf32>
    %142 = arith.addf %136, %141 : vector<2x128xf32>
    %c0_147 = arith.constant 0 : index
    %c14 = arith.constant 14 : index
    %c0_148 = arith.constant 0 : index
    %143 = vector.load %arg12[%c0_147, %c14, %c0_148] : memref<2x16x256xbf16, #tpu.memory_space<vmem>>, vector<2x1x256xbf16>
    %144 = vector.shape_cast %143 : vector<2x1x256xbf16> to vector<2x256xbf16>
    %c14_149 = arith.constant 14 : index
    %c0_150 = arith.constant 0 : index
    %c0_151 = arith.constant 0 : index
    %145 = vector.load %arg6[%c14_149, %c0_150, %c0_151] : memref<16x256x128xbf16, #tpu.memory_space<vmem>>, vector<1x256x128xbf16>
    %146 = vector.shape_cast %145 : vector<1x256x128xbf16> to vector<256x128xbf16>
    %cst_152 = arith.constant dense<0.000000e+00> : vector<2x128xf32>
    %147 = tpu.matmul %144, %146, %cst_152 {dimension_numbers = #tpu.dot_dimension_numbers<[1], [0], [0], [1], [0, 0, 1, 1], [], []>} : vector<2x256xbf16>, vector<256x128xbf16>, vector<2x128xf32> -> vector<2x128xf32>
    %148 = arith.addf %142, %147 : vector<2x128xf32>
    %c0_153 = arith.constant 0 : index
    %c15 = arith.constant 15 : index
    %c0_154 = arith.constant 0 : index
    %149 = vector.load %arg12[%c0_153, %c15, %c0_154] : memref<2x16x256xbf16, #tpu.memory_space<vmem>>, vector<2x1x256xbf16>
    %150 = vector.shape_cast %149 : vector<2x1x256xbf16> to vector<2x256xbf16>
    %c15_155 = arith.constant 15 : index
    %c0_156 = arith.constant 0 : index
    %c0_157 = arith.constant 0 : index
    %151 = vector.load %arg6[%c15_155, %c0_156, %c0_157] : memref<16x256x128xbf16, #tpu.memory_space<vmem>>, vector<1x256x128xbf16>
    %152 = vector.shape_cast %151 : vector<1x256x128xbf16> to vector<256x128xbf16>
    %cst_158 = arith.constant dense<0.000000e+00> : vector<2x128xf32>
    %153 = tpu.matmul %150, %152, %cst_158 {dimension_numbers = #tpu.dot_dimension_numbers<[1], [0], [0], [1], [0, 0, 1, 1], [], []>} : vector<2x256xbf16>, vector<256x128xbf16>, vector<2x128xf32> -> vector<2x128xf32>
    %154 = arith.addf %148, %153 : vector<2x128xf32>
    %c0_159 = arith.constant 0 : index
    %c0_160 = arith.constant 0 : index
    %155 = vector.load %arg7[%c0_159, %c0_160] : memref<1x128xf32, #tpu.memory_space<vmem>>, vector<1x128xf32>
    %156 = vector.broadcast %155 : vector<1x128xf32> to vector<2x128xf32>
    %157 = arith.addf %154, %156 : vector<2x128xf32>
    %cst_161 = arith.constant 0.000000e+00 : f32
    %158 = vector.broadcast %cst_161 : f32 to vector<2x128xf32>
    %159 = arith.maximumf %157, %158 : vector<2x128xf32>
    %160 = arith.truncf %159 : vector<2x128xf32> to vector<2x128xbf16>
    %c0_162 = arith.constant 0 : index
    %c0_163 = arith.constant 0 : index
    %161 = vector.load %arg8[%c0_162, %c0_163] : memref<128x128xbf16, #tpu.memory_space<vmem>>, vector<128x128xbf16>
    %cst_164 = arith.constant dense<0.000000e+00> : vector<2x128xf32>
    %162 = tpu.matmul %160, %161, %cst_164 {dimension_numbers = #tpu.dot_dimension_numbers<[1], [0], [0], [1], [0, 0, 1, 1], [], []>} : vector<2x128xbf16>, vector<128x128xbf16>, vector<2x128xf32> -> vector<2x128xf32>
    %c0_165 = arith.constant 0 : index
    %c0_166 = arith.constant 0 : index
    %163 = vector.load %arg9[%c0_165, %c0_166] : memref<1x128xf32, #tpu.memory_space<vmem>>, vector<1x128xf32>
    %164 = vector.broadcast %163 : vector<1x128xf32> to vector<2x128xf32>
    %165 = arith.addf %162, %164 : vector<2x128xf32>
    %c0_167 = arith.constant 0 : index
    %c0_168 = arith.constant 0 : index
    %166 = vector.load %arg10[%c0_167, %c0_168] : memref<2x128xf32, #tpu.memory_space<vmem>>, vector<2x128xf32>
    tpu.vector_store %arg10[%c0_167, %c0_168], %165 {strides = array<i32>} : memref<2x128xf32, #tpu.memory_space<vmem>>, vector<2x128xf32>,
    return
  }
  func.func @transform_0(%arg0: i32) -> (i32, i32, i32) {
    %c0_i32 = arith.constant 0 : i32
    %c0_i32_0 = arith.constant 0 : i32
    %c0_i32_1 = arith.constant 0 : i32
    return %arg0, %c0_i32, %c0_i32_0 : i32, i32, i32
  }
  func.func @transform_1(%arg0: i32) -> (i32, i32, i32) {
    %c0_i32 = arith.constant 0 : i32
    %c0_i32_0 = arith.constant 0 : i32
    %c0_i32_1 = arith.constant 0 : i32
    %c0_i32_2 = arith.constant 0 : i32
    return %c0_i32, %c0_i32_0, %c0_i32_1 : i32, i32, i32
  }
  func.func @transform_2(%arg0: i32) -> (i32, i32) {
    %c0_i32 = arith.constant 0 : i32
    %c0_i32_0 = arith.constant 0 : i32
    %c0_i32_1 = arith.constant 0 : i32
    return %c0_i32, %c0_i32_0 : i32, i32
  }
  func.func @transform_3(%arg0: i32) -> (i32, i32, i32) {
    %c0_i32 = arith.constant 0 : i32
    %c0_i32_0 = arith.constant 0 : i32
    %c0_i32_1 = arith.constant 0 : i32
    %c0_i32_2 = arith.constant 0 : i32
    return %c0_i32, %c0_i32_0, %c0_i32_1 : i32, i32, i32
  }
  func.func @transform_4(%arg0: i32) -> (i32, i32) {
    %c0_i32 = arith.constant 0 : i32
    %c0_i32_0 = arith.constant 0 : i32
    %c0_i32_1 = arith.constant 0 : i32
    return %c0_i32, %c0_i32_0 : i32, i32
  }
  func.func @transform_5(%arg0: i32) -> (i32, i32, i32) {
    %c0_i32 = arith.constant 0 : i32
    %c0_i32_0 = arith.constant 0 : i32
    %c0_i32_1 = arith.constant 0 : i32
    %c0_i32_2 = arith.constant 0 : i32
    return %c0_i32, %c0_i32_0, %c0_i32_1 : i32, i32, i32
  }
  func.func @transform_6(%arg0: i32) -> (i32, i32) {
    %c0_i32 = arith.constant 0 : i32
    %c0_i32_0 = arith.constant 0 : i32
    %c0_i32_1 = arith.constant 0 : i32
    return %c0_i32, %c0_i32_0 : i32, i32
  }
  func.func @transform_7(%arg0: i32) -> (i32, i32) {
    %c0_i32 = arith.constant 0 : i32
    %c0_i32_0 = arith.constant 0 : i32
    %c0_i32_1 = arith.constant 0 : i32
    return %c0_i32, %c0_i32_0 : i32, i32
  }
  func.func @transform_8(%arg0: i32) -> (i32, i32) {
    %c0_i32 = arith.constant 0 : i32
    %c0_i32_0 = arith.constant 0 : i32
    %c0_i32_1 = arith.constant 0 : i32
    return %c0_i32, %c0_i32_0 : i32, i32
  }
  func.func @transform_9(%arg0: i32) -> (i32, i32) {
    %c0_i32 = arith.constant 0 : i32
    %c0_i32_0 = arith.constant 0 : i32
    return %arg0, %c0_i32 : i32, i32
  }
}

</mosaic_0001>

<bundles_post_ra>
// kernel: _fused_forward.1
= control target key start
LH: loop header
LB: loop body
LE: loop exit
PB: predicated region body
PF: predicated region fallthrough
CT: control target
= control target key end

     0   :  { %14 = vsyncpa [#allocation5], 0  ;;  %s6212_s0 = inlined_call_operand.vmem [shape: bf16[2,18,64], index: 0, kind: input, shape index: {}]   ;;  %s6213_s1 = inlined_call_operand.hbm [shape: bf16[3,64,128], index: 1, kind: input, shape index: {}]   ;;  %s6214_s2 = inlined_call_operand.vmem [shape: f32[1,128], index: 2, kind: input, shape index: {}]   ;;  %s6215_s3 = inlined_call_operand.vmem [shape: bf16[3,128,256], index: 3, kind: input, shape index: {}]   ;;  %s6216_s4 = inlined_call_operand.vmem [shape: f32[1,256], index: 4, kind: input, shape index: {}]   ;;  %s6217_s5 = inlined_call_operand.hbm [shape: bf16[16,256,128], index: 5, kind: input, shape index: {}]   ;;  %s6218_s6 = inlined_call_operand.vmem [shape: f32[1,128], index: 6, kind: input, shape index: {}]   ;;  %s6219_s7 = inlined_call_operand.vmem [shape: bf16[128,128], index: 7, kind: input, shape index: {}]   ;;  %s6220_s8 = inlined_call_operand.vmem [shape: f32[1,128], index: 8, kind: input, shape index: {}]   ;;  %s6221_s9 = inlined_call_operand.hbm [shape: f32[2,128], index: 9, kind: output, shape index: {}]  }
   0x1   :  { %15 = vsyncpa [#allocation8], 0 }
   0x2   :  { %16 = vsyncpa [#allocation6], 0  ;;  %s5513_s30 = smov [#allocation4]   ;;  %s5441_s13 = scalar_lea.hbm %s6213_s1, 1536 }
   0x3   :  { %s24_s10 = sshll.u32 %s5513_s30, 4  ;;  %p5442_p0 = scmp.ne.s32.totalorder %s6213_s1, %s5441_s13  ;;  %s25_s10 = int_to_ptr.vmem [resolvable:$true] %s24_s10 }
   0x4   :  { %p5445_p1 = scmp.lt.u32.totalorder %s5441_s13, %s6213_s1 }
   0x6   :  { %p5447_p2 = pnand %p5445_p1, %p5442_p0 }
   0x8   :  { %5450 = shalt.err (!%p5447_p2)
}
   0x9   :  { %s5451_s18 = scalar_lea.vmem %s25_s10, 1536  ;;  %p5456_p4 = scmp.lt.s32.totalorder %s25_s10, %s25_s10 }
   0xa   :  { %p5452_p3 = scmp.ne.s32.totalorder %s25_s10, %s5451_s18  ;;  %p5457_p5 = scmp.lt.s32.totalorder %s5451_s18, %s5451_s18 }
   0xc   :  { %p5458_p6 = por %p5457_p5, %p5456_p4 }
   0xe   :  { %p5459_p7 = pnand %p5458_p6, %p5452_p3 }
  0x10   :  { %5462 = shalt.err (!%p5459_p7)
}
  0x11   :  { %s5514_s19 = smov 64   ;;  %s5515_s20 = smov 4  }
  0x12   :  { %30 = dma.hbm_to_vmem [thread:$0]  %s6213_s1, 1536, %s25_s10, [#allocation5], %s5514_s19, %s5514_s19, %s5515_s20  }
  0x13   :  { %s5516_s23 = smov [#allocation7]   ;;  %s5463_s27 = scalar_lea.hbm %s6217_s5, 32768 }
  0x14   :  { %s42_s24 = sshll.u32 %s5516_s23, 4  ;;  %p5464_p8 = scmp.ne.s32.totalorder %s6217_s5, %s5463_s27  ;;  %s43_s24 = int_to_ptr.vmem [resolvable:$true] %s42_s24 }
  0x15   :  { %p5467_p9 = scmp.lt.u32.totalorder %s5463_s27, %s6217_s5 }
  0x17   :  { %p5469_p10 = pnand %p5467_p9, %p5464_p8 }
  0x19   :  { %5472 = shalt.err (!%p5469_p10)
}
  0x1a   :  { %s5473_s12 = scalar_lea.vmem %s43_s24, 32768  ;;  %p5478_p12 = scmp.lt.s32.totalorder %s43_s24, %s43_s24 }
  0x1b   :  { %p5474_p11 = scmp.ne.s32.totalorder %s43_s24, %s5473_s12  ;;  %p5479_p13 = scmp.lt.s32.totalorder %s5473_s12, %s5473_s12 }
  0x1d   :  { %p5480_p0 = por %p5479_p13, %p5478_p12 }
  0x1f   :  { %p5481_p1 = pnand %p5480_p0, %p5474_p11 }
  0x21   :  { %5484 = shalt.err (!%p5481_p1)
}
  0x22   :  { %48 = dma.hbm_to_vmem [thread:$0]  %s6217_s5, 32768, %s43_s24, [#allocation8], %s5514_s19, %s5514_s19, %s5515_s20  }
  0x23   :  { %5507 = dma.done.wait [#allocation5], 1536  }
  0x24   :  { %5508 = vsyncadd [#allocation5], 4294965760 }
  0x25   :  { %5509 = dma.done.wait [#allocation8], 32768  }
  0x26   :  { %5510 = vsyncadd [#allocation8], 4294934528  ;;  %v5089_v0 = vld [vmem:[#allocation4 + $0x20] sm:$0xff]   ;;  %v5090_v1 = vld [vmem:[#allocation4 + $0x28] sm:$0xff]   ;;  %vm76_vm0 = vsmask.f32 3328 }
  0x27   :  { %5001 = vmatprep.subr.bf16.mxu0 %v5089_v0  ;;  %v5091_v2 = vld [vmem:[#allocation4 + $0x30] sm:$0xff]   ;;  %v62_v3 = vld [vmem:[%s6212_s0] sm:$0xf]  ;;  %v5601_v4 = vld [vmem:[%s6212_s0 + $0x4] sm:$0xf]  ;;  %vm166_vm3 = vcmask 523264  }
  0x28   :  { %5002 = vmatpush3.bf16.msra.mxu0 %v5089_v0  ;;  %v5606_v5 = vld [vmem:[%s6212_s0 + $0x8] sm:$0x1]  ;;  %v80_v6 = vshrl.u32 %v62_v3, 16  ;;  %v83_v7 = vshll.u32 %v62_v3, 16  ;;  %v89_v8 = vshll.u32 %v5601_v4, 16  ;;  %v93_v9 = vshrl.u32 %v5601_v4, 16 }
  0x29   :  { %5003 = vmatprep.subr.bf16.mxu0 %v5090_v1  ;;  %v5092_v10 = vld [vmem:[#allocation4 + $0x38] sm:$0xff]   ;;  %vm77_vm1 = vsmask.f32 7440  ;;  %v99_v11 = vshll.u32 %v5606_v5, 16  ;;  %v5614_v16 = vld [vmem:[%s6212_s0 + $0xc] sm:$0xf]  ;;  %v4241_v46 = vcombine.low %v62_v3, %v5601_v4 }
  0x2a   :  { %v82_v12 = vrot.slane %v80_v6, 4  ;;  %v85_v13 = vrot.slane %v83_v7, 5  ;;  %v91_v14 = vrot.slane %v89_v8, 5  ;;  %v95_v15 = vrot.slane %v93_v9, 4  ;;  %v5619_v18 = vld [vmem:[%s6212_s0 + $0x10] sm:$0xf]  ;;  %vm5631_vm2 = vmor %vm76_vm0, %vm77_vm1 }
  0x2b   :  { %v101_v17 = vrot.slane %v99_v11, 5  ;;  %v5624_v19 = vld [vmem:[%s6212_s0 + $0x14] sm:$0x1]  ;;  %v104_v20 = vshrl.u32 %v5614_v16, 16  ;;  %v107_v23 = vshll.u32 %v5614_v16, 16  ;;  %v113_v24 = vshll.u32 %v5619_v18, 16 }
  0x2c   :  { %5004 = vmatpush3.bf16.msra.mxu0 %v5090_v1  ;;  %v86_v21 = vor.u32 %v85_v13, %v82_v12  ;;  %v96_v22 = vor.u32 %v95_v15, %v91_v14  ;;  %v117_v27 = vshrl.u32 %v5619_v18, 16  ;;  %v123_v28 = vshll.u32 %v5624_v19, 16  ;;  %v5093_v33 = vld [vmem:[#allocation4] sm:$0xff]   ;;  %v5094_v44 = vld [vmem:[#allocation4 + $0x8] sm:$0xff]   ;;  %v5095_v49 = vld [vmem:[#allocation4 + $0x10] sm:$0xff]   ;;  %s5520_s21 = smov [#allocation9]  }
  0x2d   :  { %5005 = vmatprep.subr.bf16.mxu0 %v5091_v2  ;;  %v106_v26 = vrot.slane %v104_v20, 4  ;;  %v109_v31 = vrot.slane %v107_v23, 5  ;;  %v115_v32 = vrot.slane %v113_v24, 5  ;;  %vm317_vm4 = vcmask 1042432   ;;  %v311_v50 = vld [vmem:[%s6212_s0] sm:$0xe] }
  0x2e   :  { %v87_v29 = vrot.slane %v86_v21, 4  ;;  %v97_v30 = vrot.slane %v96_v22, 4  ;;  %v119_v34 = vrot.slane %v117_v27, 4  ;;  %v125_v40 = vrot.slane %v123_v28, 5  ;;  %v5096_v52 = vld [vmem:[#allocation4 + $0x18] sm:$0xff]   ;;  %v5098_v57 = vld [vmem:[#allocation4 + $0x40] sm:$0xff]  }
  0x2f   :  { %v110_v37 = vor.u32 %v109_v31, %v106_v26  ;;  %vm318_vm5 = vcmask 1046532   ;;  %v322_v51 = vrot.slane %v5601_v4, 5  ;;  %v325_v53 = vrot.slane %v5606_v5, 5  ;;  %v312_v56 = vld [vmem:[%s6212_s0 + $0xc] sm:$0xe]  ;;  %v5100_v63 = vld [vmem:[#allocation4 + $0x48] sm:$0xff]  }
  0x30   :  { %5006 = vmatpush3.bf16.msra.mxu0 %v5091_v2  ;;  %v92_v35 = vsel %vm5631_vm2, %v87_v29, %v91_v14  ;;  %v102_v36 = vsel %vm5631_vm2, %v97_v30, %v101_v17  ;;  %v120_v39 = vor.u32 %v119_v34, %v115_v32  ;;  %vm5647_vm6 = vmor %vm317_vm4, %vm318_vm5  ;;  %v4249_v54 = vrot.slane %v311_v50, 9  ;;  %v5101_v3 = vld [vmem:[#allocation4 + $0x50] sm:$0xff]   ;;  %v5102_v4 = vld [vmem:[#allocation4 + $0x58] sm:$0xff]   ;;  %s4223_s22 = sshll.u32 %s5520_s21, 4  ;;  %s4224_s22 = int_to_ptr.vmem [resolvable:$true] %s4223_s22 }
  0x31   :  { %5007 = vmatprep.subr.bf16.mxu0 %v5092_v10  ;;  %v4233_v38 = vcombine.low %v92_v35, %v102_v36  ;;  %v111_v41 = vrot.slane %v110_v37, 4  ;;  %v324_v55 = vrot.slane %v322_v51, 4  ;;  %v329_v58 = vrot.slane %v5619_v18, 5  ;;  %v5103_v8 = vld [vmem:[%s6215_s3 + $0x84] ss:$8 sps:$4 sm:$0xff]   ;;  %v5177_v36 = vld [vmem:[#allocation7 + $0xc0] sm:$0xff]   ;;  %p5490_p3 = scmp.lt.s32.totalorder %s4224_s22, %s4224_s22 }
  0x32   :  { %v121_v42 = vrot.slane %v120_v39, 4  ;;  %v323_v59 = vsel %vm5647_vm6, %v4249_v54, %v322_v51  ;;  %v332_v61 = vrot.slane %v5624_v19, 5  ;;  %v4242_v62 = vcombine.low %v5614_v16, %v5619_v18  ;;  %v5105_v9 = vld [vmem:[%s6215_s3 + $0x80] ss:$8 sps:$4 sm:$0xff]   ;;  %v453_v12 = vld [vmem:[#allocation2 + $0xc] sm:$0x1]  ;;  %709 = vmatprep.subr.bf16.mxu1 %v5103_v8 }
  0x33   :  { %5009 = vmatprep.mubr.msk.bf16.mxu0 %vm166_vm3, %v4233_v38  ;;  %v116_v43 = vsel %vm5631_vm2, %v111_v41, %v115_v32  ;;  %v326_v60 = vsel %vm5647_vm6, %v324_v55, %v325_v53  ;;  %v4250_v0 = vrot.slane %v312_v56, 9  ;;  %v331_v1 = vrot.slane %v329_v58, 4  ;;  %v450_v11 = vld [vmem:[#allocation2] sm:$0x1]  ;;  %v458_v15 = vld [vmem:[#allocation2 + $0x8] sm:$0x1]  ;;  %710 = vmatpush1.bf16.msra.mxu1 %v5105_v9 }
  0x34   :  { %5008 = vmatpush3.bf16.msra.mxu0 %v5092_v10  ;;  %v126_v45 = vsel %vm5631_vm2, %v121_v42, %v125_v40  ;;  %v4251_v2 = vcombine.low %v323_v59, %v326_v60  ;;  %vm447_vm7 = vcmask 1040384   ;;  %vm448_vm8 = vsmask.f32 256  ;;  %v461_v16 = vld [vmem:[#allocation2 + $0x14] sm:$0x1] }
  0x35   :  { %5013 = vmatprep.subr.bf16.mxu0 %v5093_v33  ;;  %v4234_v47 = vcombine.low %v116_v43, %v126_v45  ;;  %v330_v5 = vsel %vm5647_vm6, %v4250_v0, %v329_v58  ;;  %v333_v6 = vsel %vm5647_vm6, %v331_v1, %v332_v61  ;;  %vm5683_vm9 = vmand %vm447_vm7, %vm448_vm8  ;;  %vm456_vm10 = vsmask.f32 7938  ;;  %v5106_v19 = vld [vmem:[%s6215_s3 + $0x94] ss:$8 sps:$4 sm:$0xff]   ;;  %v5108_v20 = vld [vmem:[%s6215_s3 + $0x90] ss:$8 sps:$4 sm:$0xff]  }
  0x36   :  { %v4252_v7 = vcombine.low %v330_v5, %v333_v6  ;;  %v451_v13 = vsel %vm5683_vm9, 0, %v450_v11  ;;  %v454_v14 = vsel %vm5683_vm9, 0, %v453_v12  ;;  %vm457_vm11 = vmand %vm447_vm7, %vm456_vm10  ;;  %711 = vmatprep.subr.bf16.mxu1 %v5106_v19  ;;  %v5109_v21 = vld [vmem:[%s6215_s3 + $0xa4] ss:$8 sps:$4 sm:$0xff]   ;;  %v5111_v22 = vld [vmem:[%s6215_s3 + $0xa0] ss:$8 sps:$4 sm:$0xff]  }
  0x37   :  { %5010 = vmatmul.mubr.msk.bf16.vlgmr.msra.gmra.mrb[0].mxu0 %vm166_vm3, %v4234_v47  ;;  %455 = vst [vmem:[#allocation2 + $0xc] sm:$0x1] %v454_v14  ;;  %v459_v17 = vsel %vm457_vm11, 0, %v458_v15  ;;  %v462_v18 = vsel %vm457_vm11, 0, %v461_v16  ;;  %452 = vst [vmem:[#allocation2] sm:$0x1] %v451_v13  ;;  %712 = vmatpush1.bf16.msra.mxu1 %v5108_v20 }
  0x38   :  { %5014 = vmatpush3.bf16.msra.mxu0 %v5093_v33  ;;  %5021 = vmatprep.mubr.msk.bf16.mxu0 %vm166_vm3, %v4241_v46  ;;  %460 = vst [vmem:[#allocation2 + $0x8] sm:$0x1] %v459_v17  ;;  %463 = vst [vmem:[#allocation2 + $0x14] sm:$0x1] %v462_v18  ;;  %v5112_v23 = vld [vmem:[%s6215_s3 + $0xb4] ss:$8 sps:$4 sm:$0xff]  }
  0x39   :  { %5015 = vmatprep.subr.bf16.mxu0 %v5094_v44  ;;  %713 = vmatprep.subr.bf16.mxu1 %v5109_v21  ;;  %v5114_v24 = vld [vmem:[%s6215_s3 + $0xb0] ss:$8 sps:$4 sm:$0xff]   ;;  %v5115_v26 = vld [vmem:[%s6215_s3 + $0xc4] ss:$8 sps:$4 sm:$0xff]   ;;  %v5117_v27 = vld [vmem:[%s6215_s3 + $0xc0] ss:$8 sps:$4 sm:$0xff]  }
  0x3a   :  { %v5118_v28 = vld [vmem:[%s6215_s3 + $0xd4] ss:$8 sps:$4 sm:$0xff]   ;;  %v5120_v29 = vld [vmem:[%s6215_s3 + $0xd0] ss:$8 sps:$4 sm:$0xff]   ;;  %v5121_v30 = vld [vmem:[%s6215_s3 + $0xe4] ss:$8 sps:$4 sm:$0xff]  }
  0x3b   :  { %714 = vmatpush1.bf16.msra.mxu1 %v5111_v22  ;;  %v5517_v31 = vmov 0   ;;  %v5123_v32 = vld [vmem:[%s6215_s3 + $0xe0] ss:$8 sps:$4 sm:$0xff]   ;;  %v5124_v33 = vld [vmem:[%s6215_s3 + $0xf4] ss:$8 sps:$4 sm:$0xff]   ;;  %vm518_vm12 = vcmask 1043456  }
  0x3c   :  { %5016 = vmatpush3.bf16.msra.mxu0 %v5094_v44  ;;  %715 = vmatprep.subr.bf16.mxu1 %v5112_v23  ;;  %v5126_v34 = vld [vmem:[%s6215_s3 + $0xf0] ss:$8 sps:$4 sm:$0xff]   ;;  %v5129_v35 = vld [vmem:[%s6215_s3 + $0x4] ss:$8 sps:$4 sm:$0xff]   ;;  %v4259_v37 = vld [vmem:[%s6214_s2] ss:$0 sm:$0xff] }
  0x3d   :  { %5017 = vmatprep.subr.bf16.mxu0 %v5095_v49  ;;  %741 = vmatprep.mubr.bf16.mxu1 %v5517_v31  ;;  %vm476_vm13 = vsmask.f32 4368  ;;  %vm5742_vm14 = vmand %vm518_vm12, %vm456_vm10  ;;  %v5132_v6 = vld [vmem:[%s6215_s3 + $0x14] ss:$8 sps:$4 sm:$0xff]   ;;  %v5141_v25 = vld [vmem:[%s6215_s3 + $0x44] ss:$8 sps:$4 sm:$0xff]  }
  0x3e   :  { %v527_v61 = vld [vmem:[#allocation2 + $0xc] sm:$0xf]  ;;  %vm5747_vm15 = vmor %vm448_vm8, %vm476_vm13  ;;  %vm1207_vm0 = vcmask 1041409   ;;  %vm5519_vm1 = vmmov 0  }
  0x3f   :  { %716 = vmatpush1.bf16.msra.mxu1 %v5114_v24  ;;  %v524_v15 = vld [vmem:[#allocation2 + $0x8] sm:$0x1] }
  0x40   :  { %5018 = vmatpush3.bf16.msra.mxu0 %v5095_v49  ;;  %717 = vmatprep.subr.bf16.mxu1 %v5115_v26 }
  0x41   :  { %5019 = vmatprep.subr.bf16.mxu0 %v5096_v52 }
  0x43   :  { %718 = vmatpush1.bf16.msra.mxu1 %v5117_v27 }
  0x44   :  { %5020 = vmatpush3.bf16.msra.mxu0 %v5096_v52  ;;  %719 = vmatprep.subr.bf16.mxu1 %v5118_v28 }
  0x45   :  { %5025 = vmatprep.subr.bf16.mxu0 %v5098_v57 }
  0x47   :  { %5022 = vmatmul.mubr.msk.bf16.vlgmr.msra.gmra.mrb[0].mxu0 %vm166_vm3, %v4242_v62  ;;  %720 = vmatpush1.bf16.msra.mxu1 %v5120_v29 }
  0x48   :  { %5026 = vmatpush3.bf16.msra.mxu0 %v5098_v57  ;;  %5033 = vmatprep.mubr.msk.bf16.mxu0 %vm166_vm3, %v4251_v2  ;;  %v520_v2 = vld [vmem:[#allocation2] sm:$0xf] }
  0x49   :  { %5027 = vmatprep.subr.bf16.mxu0 %v5100_v63  ;;  %721 = vmatprep.subr.bf16.mxu1 %v5121_v30 }
  0x4b   :  { %722 = vmatpush1.bf16.msra.mxu1 %v5123_v32 }
  0x4c   :  { %5028 = vmatpush3.bf16.msra.mxu0 %v5100_v63  ;;  %723 = vmatprep.subr.bf16.mxu1 %v5124_v33 }
  0x4d   :  { %5029 = vmatprep.subr.bf16.mxu0 %v5101_v3 }
  0x4f   :  { %724 = vmatpush1.bf16.msra.mxu1 %v5126_v34 }
  0x50   :  { %5030 = vmatpush3.bf16.msra.mxu0 %v5101_v3  ;;  %854 = vmatprep.subr.bf16.mxu1 %v5129_v35 }
  0x51   :  { %5031 = vmatprep.subr.bf16.mxu0 %v5102_v4 }
  0x54   :  { %5032 = vmatpush3.bf16.msra.mxu0 %v5102_v4 }
  0x55   :  { %4640 = vmatprep.subr.bf16.mxu0 %v5177_v36 }
  0x57   :  { %5034 = vmatmul.mubr.msk.bf16.vlgmr.msra.gmra.mrb[0].mxu0 %vm166_vm3, %v4252_v7  ;;  %v531_v7 = vld [vmem:[#allocation2 + $0x14] sm:$0x1] }
 0x12a   :  { %v5035_v38 = vpop.f32.mrb[0].mxu0 }
 0x12b   :  { %v441_v39 = vadd.f32 %v5035_v38, %v4259_v37  ;;  %v413_v40 = vpop.f32.mrb[1].mxu0 }
 0x12c   :  { %v439_v41 = vadd.f32 %v4259_v37, %v413_v40  ;;  %v5036_v42 = vpop.f32.mrb[2].mxu0 }
 0x12d   :  { %v445_v43 = vmax.f32 %v441_v39, 0.0  ;;  %v442_v44 = vadd.f32 %v5036_v42, %v4259_v37  ;;  %v416_v45 = vpop.f32.mrb[3].mxu0 }
 0x12e   :  { %v443_v46 = vmax.f32 %v439_v41, 0.0  ;;  %v440_v47 = vadd.f32 %v4259_v37, %v416_v45 }
 0x12f   :  { %v4620_v49 = vpack.c.bf16 %v445_v43, %v445_v43  ;;  %v446_v50 = vmax.f32 %v442_v44, 0.0 }
 0x130   :  { %v4618_v51 = vpack.c.bf16 %v443_v46, %v443_v46  ;;  %v444_v52 = vmax.f32 %v440_v47, 0.0 }
 0x131   :  { %v496_v53 = vshrl.u32 %v4620_v49, 16  ;;  %v4621_v54 = vpack.c.bf16 %v446_v50, %v446_v50  ;;  %v499_v58 = vshll.u32 %v4620_v49, 16 }
 0x132   :  { %v479_v55 = vshrl.u32 %v4618_v51, 16  ;;  %v4619_v56 = vpack.c.bf16 %v444_v52, %v444_v52  ;;  %v482_v63 = vshll.u32 %v4618_v51, 16 }
 0x133   :  { %v498_v57 = vrot.slane %v496_v53, 7  ;;  %v504_v59 = vshrl.u32 %v4621_v54, 16  ;;  %v507_v4 = vshll.u32 %v4621_v54, 16 }
 0x134   :  { %v481_v62 = vrot.slane %v479_v55, 7  ;;  %v487_v0 = vshrl.u32 %v4619_v56, 16  ;;  %v490_v9 = vshll.u32 %v4619_v56, 16 }
 0x135   :  { %v501_v1 = vor.u32 %v499_v58, %v498_v57  ;;  %v506_v3 = vrot.slane %v504_v59, 7  ;;  %v502_v11 = vrot.slane %v498_v57, 4 }
 0x136   :  { %v484_v5 = vor.u32 %v482_v63, %v481_v62  ;;  %v489_v8 = vrot.slane %v487_v0, 7  ;;  %v485_v16 = vrot.slane %v481_v62, 4  ;;  %v5127_v0 = vld [vmem:[%s6215_s3] ss:$8 sps:$4 sm:$0xff]  }
 0x137   :  { %v528_v12 = vsel %vm5742_vm14, %v501_v1, %v527_v61  ;;  %v509_v13 = vor.u32 %v507_v4, %v506_v3  ;;  %v511_v14 = vrot.slane %v506_v3, 4 }
 0x138   :  { %529 = vst [vmem:[#allocation2 + $0xc] sm:$0xf] %v528_v12  ;;  %v521_v17 = vsel %vm5742_vm14, %v484_v5, %v520_v2  ;;  %v492_v18 = vor.u32 %v490_v9, %v489_v8  ;;  %v494_v19 = vrot.slane %v489_v8, 4 }
 0x139   :  { %522 = vst [vmem:[#allocation2] sm:$0xf] %v521_v17  ;;  %v510_v20 = vsel %vm5747_vm15, %v502_v11, %v509_v13  ;;  %v532_v21 = vsel %vm5683_vm9, %v511_v14, %v531_v7 }
 0x13a   :  { %530 = vst [vmem:[#allocation2 + $0x10] sm:$0xf] %v510_v20  ;;  %533 = vst [vmem:[#allocation2 + $0x14] sm:$0x1] %v532_v21  ;;  %v493_v22 = vsel %vm5747_vm15, %v485_v16, %v492_v18  ;;  %v525_v23 = vsel %vm5683_vm9, %v494_v19, %v524_v15  ;;  %v5130_v15 = vld [vmem:[%s6215_s3 + $0x10] ss:$8 sps:$4 sm:$0xff]  }
 0x13b   :  { %523 = vst [vmem:[#allocation2 + $0x4] sm:$0xf] %v493_v22  ;;  %526 = vst [vmem:[#allocation2 + $0x8] sm:$0x1] %v525_v23  ;;  %v5135_v19 = vld [vmem:[%s6215_s3 + $0x24] ss:$8 sps:$4 sm:$0xff]  }
 0x13c   :  { %v5133_v20 = vld [vmem:[%s6215_s3 + $0x20] ss:$8 sps:$4 sm:$0xff]   ;;  %v5138_v23 = vld [vmem:[%s6215_s3 + $0x34] ss:$8 sps:$4 sm:$0xff]  }
 0x13f   :  { %v5763_v24 = vld [vmem:[#allocation2 + $0xc] sm:$0xf] }
 0x140   :  { %v5765_v26 = vld [vmem:[#allocation2] sm:$0xf]  ;;  %v581_v33 = vshrl.u32 %v5763_v24, 16  ;;  %v584_v10 = vshll.u32 %v5763_v24, 16  ;;  %v908_v55 = vld [vmem:[#allocation2 + $0xc] sm:$0xe] }
 0x141   :  { %v557_v27 = vshrl.u32 %v5765_v26, 16  ;;  %v560_v28 = vshll.u32 %v5765_v26, 16  ;;  %v5769_v29 = vld [vmem:[#allocation2 + $0x10] sm:$0xf]  ;;  %v907_v47 = vld [vmem:[#allocation2] sm:$0xe] }
 0x142   :  { %v5771_v30 = vld [vmem:[#allocation2 + $0x4] sm:$0xf]  ;;  %v554_v32 = vld [vmem:[#allocation2 + $0x8] sm:$0x1]  ;;  %v590_v39 = vshll.u32 %v5769_v29, 16  ;;  %v594_v43 = vshrl.u32 %v5769_v29, 16 }
 0x143   :  { %v559_v34 = vrot.slane %v557_v27, 4  ;;  %v562_v35 = vrot.slane %v560_v28, 5  ;;  %v566_v36 = vshll.u32 %v5771_v30, 16  ;;  %v570_v37 = vshrl.u32 %v5771_v30, 16  ;;  %v555_v51 = vld [vmem:[#allocation2 + $0x14] sm:$0x1] }
 0x144   :  { %v576_v38 = vshll.u32 %v554_v32, 16  ;;  %v583_v44 = vrot.slane %v581_v33, 4  ;;  %v586_v45 = vrot.slane %v584_v10, 5  ;;  %v592_v46 = vrot.slane %v590_v39, 5  ;;  %v5136_v27 = vld [vmem:[%s6215_s3 + $0x30] ss:$8 sps:$4 sm:$0xff]  }
 0x145   :  { %v563_v40 = vor.u32 %v562_v35, %v559_v34  ;;  %v568_v41 = vrot.slane %v566_v36, 5  ;;  %v572_v42 = vrot.slane %v570_v37, 4  ;;  %v596_v52 = vrot.slane %v594_v43, 4  ;;  %v5139_v28 = vld [vmem:[%s6215_s3 + $0x40] ss:$8 sps:$4 sm:$0xff]  }
 0x146   :  { %v918_v53 = vrot.slane %v554_v32, 5  ;;  %v915_v54 = vrot.slane %v5771_v30, 5  ;;  %v578_v57 = vrot.slane %v576_v38, 5  ;;  %v4316_v59 = vrot.slane %v907_v47, 9  ;;  %v5144_v32 = vld [vmem:[%s6215_s3 + $0x54] ss:$8 sps:$4 sm:$0xff]  }
 0x147   :  { %v564_v49 = vrot.slane %v563_v40, 4  ;;  %v573_v50 = vor.u32 %v572_v42, %v568_v41  ;;  %v597_v58 = vor.u32 %v596_v52, %v592_v46  ;;  %v587_v60 = vor.u32 %v586_v45, %v583_v44  ;;  %v5142_v33 = vld [vmem:[%s6215_s3 + $0x50] ss:$8 sps:$4 sm:$0xff]   ;;  %v5147_v10 = vld [vmem:[%s6215_s3 + $0x64] ss:$8 sps:$4 sm:$0xff]  }
 0x148   :  { %v600_v61 = vshll.u32 %v555_v51, 16  ;;  %v917_v62 = vrot.slane %v915_v54, 4  ;;  %v922_v63 = vrot.slane %v5769_v29, 5  ;;  %v5790_v3 = vsel %vm5647_vm6, %v4316_v59, %v915_v54  ;;  %v5145_v34 = vld [vmem:[%s6215_s3 + $0x60] ss:$8 sps:$4 sm:$0xff]   ;;  %v5178_v52 = vld [vmem:[#allocation7 + $0x80] sm:$0xff]  }
 0x149   :  { %v574_v56 = vrot.slane %v573_v50, 4  ;;  %v569_v1 = vsel %vm5631_vm2, %v564_v49, %v568_v41  ;;  %v4317_v4 = vrot.slane %v908_v55, 9  ;;  %v925_v9 = vrot.slane %v555_v51, 5  ;;  %v5150_v35 = vld [vmem:[%s6215_s3 + $0x74] ss:$8 sps:$4 sm:$0xff]   ;;  %4641 = vmatpush3.bf16.msra.mxu0 %v5178_v52  ;;  %v5181_v55 = vld [vmem:[#allocation7 + $0xc8] sm:$0xff]  }
 0x14a   :  { %v5797_v7 = vsel %vm5647_vm6, %v917_v62, %v918_v53  ;;  %v924_v8 = vrot.slane %v922_v63, 4  ;;  %v598_v11 = vrot.slane %v597_v58, 4  ;;  %v588_v16 = vrot.slane %v587_v60, 4  ;;  %v5148_v36 = vld [vmem:[%s6215_s3 + $0x70] ss:$8 sps:$4 sm:$0xff]   ;;  %v5184_v58 = vld [vmem:[#allocation7 + $0x108] sm:$0xff]   ;;  %4642 = vmatprep.subr.bf16.mxu0 %v5181_v55 }
 0x14b   :  { %v579_v2 = vsel %vm5631_vm2, %v574_v56, %v578_v57  ;;  %v4334_v12 = vcombine.low %v5790_v3, %v5797_v7  ;;  %v5803_v13 = vsel %vm5647_vm6, %v4317_v4, %v922_v63  ;;  %v602_v17 = vrot.slane %v600_v61, 5  ;;  %v5154_v37 = vld [vmem:[%s6215_s3 + $0x104] ss:$8 sps:$4 sm:$0xff]   ;;  %v5152_v38 = vld [vmem:[%s6215_s3 + $0x100] ss:$8 sps:$4 sm:$0xff]   ;;  %v5179_v53 = vld [vmem:[#allocation7 + $0x140] sm:$0xff]  }
 0x14c   :  { %v4280_v5 = vcombine.low %v569_v1, %v579_v2  ;;  %v5807_v14 = vsel %vm5647_vm6, %v924_v8, %v925_v9  ;;  %v593_v21 = vsel %vm5631_vm2, %v588_v16, %v592_v46  ;;  %v4298_v39 = vcombine.low %v5765_v26, %v5771_v30  ;;  %v5157_v40 = vld [vmem:[%s6215_s3 + $0x114] ss:$8 sps:$4 sm:$0xff]   ;;  %v5155_v41 = vld [vmem:[%s6215_s3 + $0x110] ss:$8 sps:$4 sm:$0xff]   ;;  %v5161_v42 = vld [vmem:[%s6215_s3 + $0x124] ss:$8 sps:$4 sm:$0xff]  }
 0x14d   :  { %v4335_v18 = vcombine.low %v5803_v13, %v5807_v14  ;;  %v603_v48 = vsel %vm5631_vm2, %v598_v11, %v602_v17  ;;  %v5159_v26 = vld [vmem:[%s6215_s3 + $0x120] ss:$8 sps:$4 sm:$0xff]   ;;  %v4299_v30 = vcombine.low %v5763_v24, %v5769_v29  ;;  %v5164_v43 = vld [vmem:[%s6215_s3 + $0x134] ss:$8 sps:$4 sm:$0xff]   ;;  %v5162_v44 = vld [vmem:[%s6215_s3 + $0x130] ss:$8 sps:$4 sm:$0xff]  }
 0x14e   :  { %742 = vmatmul.mubr.bf16.vlgmr.msra.gmra.mrb[0].mxu1 %v4280_v5  ;;  %v4281_v22 = vcombine.low %v593_v21, %v603_v48  ;;  %v5167_v45 = vld [vmem:[%s6215_s3 + $0x144] ss:$8 sps:$4 sm:$0xff]   ;;  %v5165_v24 = vld [vmem:[%s6215_s3 + $0x140] ss:$8 sps:$4 sm:$0xff]   ;;  %v5170_v29 = vld [vmem:[%s6215_s3 + $0x154] ss:$8 sps:$4 sm:$0xff]  }
 0x14f   :  { %855 = vmatpush1.bf16.msra.mxu1 %v5127_v0  ;;  %751 = vmatprep.mubr.bf16.mxu1 %v5517_v31  ;;  %v5168_v46 = vld [vmem:[%s6215_s3 + $0x150] ss:$8 sps:$4 sm:$0xff]   ;;  %v5173_v47 = vld [vmem:[%s6215_s3 + $0x164] ss:$8 sps:$4 sm:$0xff]   ;;  %v5171_v49 = vld [vmem:[%s6215_s3 + $0x160] ss:$8 sps:$4 sm:$0xff]  }
 0x150   :  { %856 = vmatprep.subr.bf16.mxu1 %v5132_v6  ;;  %v5176_v50 = vld [vmem:[%s6215_s3 + $0x174] ss:$8 sps:$4 sm:$0xff]   ;;  %v5174_v51 = vld [vmem:[%s6215_s3 + $0x170] ss:$8 sps:$4 sm:$0xff]   ;;  %v5182_v56 = vld [vmem:[#allocation7 + $0x88] sm:$0xff]  }
 0x151   :  { %v5180_v54 = vld [vmem:[#allocation7 + $0x100] sm:$0xff]   ;;  %v5183_v57 = vld [vmem:[#allocation7 + $0x148] sm:$0xff]   ;;  %v5185_v59 = vld [vmem:[#allocation7 + $0xd0] sm:$0xff]   ;;  %4643 = vmatpush3.bf16.msra.mxu0 %v5182_v56 }
 0x152   :  { %v5186_v60 = vld [vmem:[#allocation7 + $0x90] sm:$0xff]   ;;  %4644 = vmatprep.subr.bf16.mxu0 %v5185_v59  ;;  %v5189_v62 = vld [vmem:[#allocation7 + $0xd8] sm:$0xff]   ;;  %v5193_v2 = vld [vmem:[#allocation7 + $0xe0] sm:$0xff]  }
 0x153   :  { %857 = vmatpush1.bf16.msra.mxu1 %v5130_v15  ;;  %v5188_v61 = vld [vmem:[#allocation7 + $0x110] sm:$0xff]   ;;  %v5190_v63 = vld [vmem:[#allocation7 + $0x98] sm:$0xff]   ;;  %v5195_v3 = vld [vmem:[#allocation7 + $0x160] sm:$0xff]  }
 0x154   :  { %858 = vmatprep.subr.bf16.mxu1 %v5135_v19  ;;  %v5191_v0 = vld [vmem:[#allocation7 + $0x158] sm:$0xff]   ;;  %v5194_v4 = vld [vmem:[#allocation7 + $0xa0] sm:$0xff]   ;;  %v5197_v5 = vld [vmem:[#allocation7 + $0xe8] sm:$0xff]  }
 0x155   :  { %4645 = vmatpush3.bf16.msra.mxu0 %v5186_v60  ;;  %v5192_v1 = vld [vmem:[#allocation7 + $0x118] sm:$0xff]   ;;  %v5196_v6 = vld [vmem:[#allocation7 + $0x120] sm:$0xff]   ;;  %v5199_v7 = vld [vmem:[#allocation7 + $0x168] sm:$0xff]  }
 0x156   :  { %752 = vmatmul.mubr.bf16.gmra.mrb[4].mxu1 %v4281_v22  ;;  %4646 = vmatprep.subr.bf16.mxu0 %v5189_v62  ;;  %v5198_v8 = vld [vmem:[#allocation7 + $0xa8] sm:$0xff]   ;;  %v5201_v9 = vld [vmem:[#allocation7 + $0xf0] sm:$0xff]   ;;  %v5205_v14 = vld [vmem:[#allocation7 + $0xf8] sm:$0xff]  }
 0x157   :  { %859 = vmatpush1.bf16.msra.mxu1 %v5133_v20  ;;  %886 = vmatprep.mubr.bf16.mxu1 %v5517_v31  ;;  %v5200_v11 = vld [vmem:[#allocation7 + $0x128] sm:$0xff]   ;;  %v5202_v13 = vld [vmem:[#allocation7 + $0xb0] sm:$0xff]   ;;  %v5207_v16 = vld [vmem:[#allocation7 + $0x178] sm:$0xff]   ;;  %v1095_v20 = vlaneseq }
 0x158   :  { %860 = vmatprep.subr.bf16.mxu1 %v5138_v23  ;;  %v5204_v15 = vld [vmem:[#allocation7 + $0x130] sm:$0xff]   ;;  %v5206_v17 = vld [vmem:[#allocation7 + $0xb8] sm:$0xff]   ;;  %v5211_v48 = vld [vmem:[#allocation7 + $0x240] sm:$0xff]  }
 0x159   :  { %4647 = vmatpush3.bf16.msra.mxu0 %v5190_v63  ;;  %v5208_v19 = vld [vmem:[#allocation7 + $0x138] sm:$0xff]   ;;  %v1096_v21 = vshrl.u32 %v1095_v20, 7  ;;  %v1093_v23 = vld [vmem:[%s6216_s4] sm:$0x3] }
 0x15a   :  { %4648 = vmatprep.subr.bf16.mxu0 %v5193_v2 }
 0x15b   :  { %861 = vmatpush1.bf16.msra.mxu1 %v5136_v27  ;;  %v1097_v22 = vsub.s32 0, %v1096_v21  ;;  %v1101_v27 = vsub.s32 1, %v1096_v21  ;;  %v5210_v21 = vld [vmem:[#allocation7] sm:$0xff]  }
 0x15c   :  { %862 = vmatprep.subr.bf16.mxu1 %v5141_v25 }
 0x15d   :  { %4649 = vmatpush3.bf16.msra.mxu0 %v5194_v4  ;;  %v1098_v25 = vrot.slane %v1093_v23, %v1097_v22 }
 0x15e   :  { %4650 = vmatprep.subr.bf16.mxu0 %v5197_v5 }
 0x15f   :  { %863 = vmatpush1.bf16.msra.mxu1 %v5139_v28  ;;  %v1102_v28 = vrot.slane %v1093_v23, %v1101_v27 }
 0x160   :  { %864 = vmatprep.subr.bf16.mxu1 %v5144_v32 }
 0x161   :  { %4651 = vmatpush3.bf16.msra.mxu0 %v5198_v8 }
 0x162   :  { %4652 = vmatprep.subr.bf16.mxu0 %v5201_v9 }
 0x163   :  { %865 = vmatpush1.bf16.msra.mxu1 %v5142_v33 }
 0x164   :  { %866 = vmatprep.subr.bf16.mxu1 %v5147_v10 }
 0x165   :  { %4653 = vmatpush3.bf16.msra.mxu0 %v5202_v13 }
 0x166   :  { %4654 = vmatprep.subr.bf16.mxu0 %v5205_v14 }
 0x167   :  { %867 = vmatpush1.bf16.msra.mxu1 %v5145_v34 }
 0x168   :  { %868 = vmatprep.subr.bf16.mxu1 %v5150_v35 }
 0x169   :  { %4655 = vmatpush3.bf16.msra.mxu0 %v5206_v17 }
 0x16b   :  { %869 = vmatpush1.bf16.msra.mxu1 %v5148_v36 }
 0x16c   :  { %1032 = vmatprep.subr.bf16.mxu1 %v5154_v37 }
 0x16e   :  { %887 = vmatmul.mubr.bf16.vlgmr.msra.gmra.mrb[0].mxu1 %v4298_v39 }
 0x16f   :  { %1033 = vmatpush1.bf16.msra.mxu1 %v5152_v38  ;;  %896 = vmatprep.mubr.bf16.mxu1 %v5517_v31 }
 0x170   :  { %1034 = vmatprep.subr.bf16.mxu1 %v5157_v40 }
 0x173   :  { %1035 = vmatpush1.bf16.msra.mxu1 %v5155_v41 }
 0x174   :  { %1036 = vmatprep.subr.bf16.mxu1 %v5161_v42 }
 0x176   :  { %897 = vmatmul.mubr.bf16.gmra.mrb[4].mxu1 %v4299_v30 }
 0x177   :  { %1037 = vmatpush1.bf16.msra.mxu1 %v5159_v26  ;;  %1064 = vmatprep.mubr.bf16.mxu1 %v5517_v31 }
 0x178   :  { %1038 = vmatprep.subr.bf16.mxu1 %v5164_v43 }
 0x17b   :  { %1039 = vmatpush1.bf16.msra.mxu1 %v5162_v44 }
 0x17c   :  { %1040 = vmatprep.subr.bf16.mxu1 %v5167_v45 }
 0x17f   :  { %1041 = vmatpush1.bf16.msra.mxu1 %v5165_v24 }
 0x180   :  { %1042 = vmatprep.subr.bf16.mxu1 %v5170_v29 }
 0x183   :  { %1043 = vmatpush1.bf16.msra.mxu1 %v5168_v46 }
 0x184   :  { %1044 = vmatprep.subr.bf16.mxu1 %v5173_v47 }
 0x187   :  { %1045 = vmatpush1.bf16.msra.mxu1 %v5171_v49 }
 0x188   :  { %1046 = vmatprep.subr.bf16.mxu1 %v5176_v50 }
 0x18b   :  { %1047 = vmatpush1.bf16.msra.mxu1 %v5174_v51 }
 0x18c   :  { %4684 = vmatprep.subr.bf16.mxu1 %v5179_v53 }
 0x18e   :  { %1065 = vmatmul.mubr.bf16.vlgmr.msra.gmra.mrb[0].mxu1 %v4334_v12  ;;  %v5203_v12 = vld [vmem:[#allocation7 + $0x170] sm:$0xff]  }
 0x18f   :  { %1074 = vmatprep.mubr.bf16.mxu1 %v5517_v31  ;;  %4685 = vmatpush3.bf16.msra.mxu1 %v5180_v54  ;;  %v5187_v31 = vld [vmem:[#allocation7 + $0x150] sm:$0xff]  }
 0x190   :  { %4686 = vmatprep.subr.bf16.mxu1 %v5183_v57 }
 0x193   :  { %4687 = vmatpush3.bf16.msra.mxu1 %v5184_v58 }
 0x194   :  { %4688 = vmatprep.subr.bf16.mxu1 %v5187_v31 }
 0x196   :  { %1075 = vmatmul.mubr.bf16.gmra.mrb[4].mxu1 %v4335_v18  ;;  %v5209_v18 = vld [vmem:[#allocation7 + $0x40] sm:$0xff]  }
 0x197   :  { %4689 = vmatpush3.bf16.msra.mxu1 %v5188_v61  ;;  %4662 = vmatprep.subr.bf16.mxu0 %v5209_v18 }
 0x198   :  { %4690 = vmatprep.subr.bf16.mxu1 %v5191_v0 }
 0x19b   :  { %4691 = vmatpush3.bf16.msra.mxu1 %v5192_v1 }
 0x19c   :  { %4692 = vmatprep.subr.bf16.mxu1 %v5195_v3 }
 0x19f   :  { %4693 = vmatpush3.bf16.msra.mxu1 %v5196_v6 }
 0x1a0   :  { %4694 = vmatprep.subr.bf16.mxu1 %v5199_v7 }
 0x1a3   :  { %4695 = vmatpush3.bf16.msra.mxu1 %v5200_v11 }
 0x1a4   :  { %4696 = vmatprep.subr.bf16.mxu1 %v5203_v12 }
 0x1a7   :  { %4697 = vmatpush3.bf16.msra.mxu1 %v5204_v15 }
 0x1a8   :  { %4698 = vmatprep.subr.bf16.mxu1 %v5207_v16 }
 0x1ab   :  { %4699 = vmatpush3.bf16.msra.mxu1 %v5208_v19 }
 0x1ac   :  { %4728 = vmatprep.subr.bf16.mxu1 %v5211_v48 }
 0x261   :  { %v1066_v32 = vpop.f32.mrb[0].mxu1 }
 0x262   :  { %v1105_v33 = vadd.f32 %v1098_v25, %v1066_v32  ;;  %v1068_v10 = vpop.f32.mrb[1].mxu1 }
 0x263   :  { %v1106_v34 = vadd.f32 %v1102_v28, %v1068_v10  ;;  %v1070_v35 = vpop.f32.mrb[2].mxu1 }
 0x264   :  { %v1107_v36 = vadd.f32 %v1098_v25, %v1070_v35  ;;  %v1072_v37 = vpop.f32.mrb[3].mxu1  ;;  %v1113_v39 = vmax.f32 %v1105_v33, 0.0  ;;  %v5213_v33 = vld [vmem:[#allocation7 + $0x48] sm:$0xff]  }
 0x265   :  { %v1108_v38 = vadd.f32 %v1102_v28, %v1072_v37  ;;  %v1114_v41 = vmax.f32 %v1106_v34, 0.0 }
 0x266   :  { %v1115_v40 = vmax.f32 %v1107_v36, 0.0  ;;  %v5212_v36 = vld [vmem:[#allocation7 + $0x200] sm:$0xff]  }
 0x267   :  { %v1116_v42 = vmax.f32 %v1108_v38, 0.0  ;;  %v5214_v38 = vld [vmem:[#allocation7 + $0x8] sm:$0xff]  }
 0x268   :  { %v1121_v26 = vpack.c.bf16 %v1115_v40, %v1113_v39  ;;  %v5215_v39 = vld [vmem:[#allocation7 + $0x248] sm:$0xff]  }
 0x269   :  { %v1122_v30 = vpack.c.bf16 %v1116_v42, %v1114_v41  ;;  %v1076_v43 = vpop.f32.mrb[4].mxu1  ;;  %v5217_v42 = vld [vmem:[#allocation7 + $0x50] sm:$0xff]  }
 0x26a   :  { %1125 = vst [vmem:[#allocation3] sm:$0xff] %v1121_v26  ;;  %v1109_v44 = vadd.f32 %v1098_v25, %v1076_v43  ;;  %v1078_v45 = vpop.f32.mrb[5].mxu1 }
 0x26b   :  { %1126 = vst [vmem:[#allocation3 + $0x8] sm:$0xff] %v1122_v30  ;;  %v1110_v24 = vadd.f32 %v1102_v28, %v1078_v45  ;;  %v1080_v29 = vpop.f32.mrb[6].mxu1  ;;  %v5216_v30 = vld [vmem:[#allocation7 + $0x208] sm:$0xff]   ;;  %v5219_v45 = vld [vmem:[#allocation7 + $0x250] sm:$0xff]  }
 0x26c   :  { %v1111_v46 = vadd.f32 %v1098_v25, %v1080_v29  ;;  %v1082_v47 = vpop.f32.mrb[7].mxu1  ;;  %v1117_v50 = vmax.f32 %v1109_v44, 0.0  ;;  %v5218_v44 = vld [vmem:[#allocation7 + $0x10] sm:$0xff]   ;;  %v5221_v29 = vld [vmem:[#allocation7 + $0x58] sm:$0xff]  }
 0x26d   :  { %v1112_v49 = vadd.f32 %v1102_v28, %v1082_v47  ;;  %v1118_v52 = vmax.f32 %v1110_v24, 0.0 }
 0x26e   :  { %v1119_v51 = vmax.f32 %v1111_v46, 0.0 }
 0x26f   :  { %v1120_v53 = vmax.f32 %v1112_v49, 0.0  ;;  %v5220_v49 = vld [vmem:[#allocation7 + $0x210] sm:$0xff]  }
 0x270   :  { %v1123_v54 = vpack.c.bf16 %v1119_v51, %v1117_v50 }
 0x271   :  { %v1124_v55 = vpack.c.bf16 %v1120_v53, %v1118_v52  ;;  %v5920_v56 = vld [vmem:[#allocation3] sm:$0x1]  ;;  %v5923_v59 = vld [vmem:[#allocation3] sm:$0x2]  ;;  %v5971_v24 = vld [vmem:[#allocation3] sm:$0x10] }
 0x272   :  { %1127 = vst [vmem:[#allocation3 + $0x10] sm:$0xff] %v1123_v54  ;;  %v1130_v57 = vld [vmem:[#allocation3 + $0x8] sm:$0x1]  ;;  %v1202_v58 = vunpack.c.l.b16 %v5920_v56  ;;  %v5925_v60 = vld [vmem:[#allocation3 + $0x8] sm:$0x2]  ;;  %v1536_v62 = vunpack.c.l.b16 %v5923_v59  ;;  %v2652_v50 = vunpack.c.h.b16 %v5971_v24  ;;  %v5222_v52 = vld [vmem:[#allocation7 + $0x18] sm:$0xff]  }
 0x273   :  { %1128 = vst [vmem:[#allocation3 + $0x18] sm:$0xff] %v1124_v55  ;;  %v1203_v31 = vunpack.c.l.b16 %v1130_v57  ;;  %v5927_v61 = vld [vmem:[#allocation3 + $0x8] sm:$0x4]  ;;  %v1537_v1 = vunpack.c.l.b16 %v5925_v60  ;;  %v5966_v40 = vld [vmem:[#allocation3 + $0x8] sm:$0x10]  ;;  %v5223_v53 = vld [vmem:[#allocation7 + $0x258] sm:$0xff]  }
 0x274   :  { %v1206_v0 = vrot.slane %v1202_v58, 1  ;;  %v1909_v8 = vunpack.c.l.b16 %v5927_v61  ;;  %v1540_v15 = vrot.slane %v1536_v62, 2  ;;  %v2653_v43 = vunpack.c.h.b16 %v5966_v40  ;;  %v5225_v54 = vld [vmem:[#allocation7 + $0x60] sm:$0xff]   ;;  %v5282_v40 = vld [vmem:[#allocation7 + $0x290] sm:$0xff]   ;;  %v5312_v24 = vld [vmem:[#allocation7 + $0x508] sm:$0xff]  }
 0x275   :  { %v1209_v11 = vrot.slane %v1203_v31, 1  ;;  %v1543_v19 = vrot.slane %v1537_v1, 2  ;;  %v5242_v60 = vld [vmem:[#allocation7 + $0x180] sm:$0xff]  }
 0x276   :  { %v1915_v22 = vrot.slane %v1909_v8, 4  ;;  %v2836_v51 = vrot.slane %v2653_v43, 1 }
 0x279   :  { %v5930_v63 = vld [vmem:[#allocation3 + $0x10] sm:$0x1]  ;;  %v5935_v2 = vld [vmem:[#allocation3 + $0x10] sm:$0x2]  ;;  %v5974_v47 = vld [vmem:[#allocation3 + $0x10] sm:$0x10] }
 0x27a   :  { %v1132_v3 = vld [vmem:[#allocation3 + $0x18] sm:$0x1]  ;;  %v1204_v4 = vunpack.c.l.b16 %v5930_v63  ;;  %v5938_v5 = vld [vmem:[#allocation3 + $0x18] sm:$0x2]  ;;  %v1538_v6 = vunpack.c.l.b16 %v5935_v2  ;;  %v5941_v7 = vld [vmem:[#allocation3 + $0x18] sm:$0x4]  ;;  %v2654_v55 = vunpack.c.h.b16 %v5974_v47 }
 0x27b   :  { %v1205_v9 = vunpack.c.l.b16 %v1132_v3  ;;  %v1539_v12 = vunpack.c.l.b16 %v5938_v5  ;;  %v1911_v13 = vunpack.c.l.b16 %v5941_v7  ;;  %v5968_v26 = vld [vmem:[#allocation3 + $0x18] sm:$0x10]  ;;  %v5226_v3 = vld [vmem:[#allocation7 + $0x20] sm:$0xff]   ;;  %v1723_v63 = vrot.slane %v1537_v1, 3 }
 0x27c   :  { %v1208_v14 = vsel %vm1207_vm0, %v1204_v4, %v1206_v0  ;;  %v1541_v16 = vrot.slane %v1538_v6, 1  ;;  %v2655_v46 = vunpack.c.h.b16 %v5968_v26  ;;  %v2834_v0 = vrot.slane %v2652_v50, 1 }
 0x27d   :  { %v1210_v17 = vsel %vm1207_vm0, %v1205_v9, %v1209_v11  ;;  %v1353_v18 = vrot.slane %v1205_v9, 7  ;;  %v1544_v48 = vrot.slane %v1539_v12, 1  ;;  %v1916_v23 = vrot.slane %v1911_v13, 3  ;;  %v5227_v9 = vld [vmem:[#allocation7 + $0x260] sm:$0xff]   ;;  %v5229_v11 = vld [vmem:[#allocation7 + $0x68] sm:$0xff]  }
 0x27e   :  { %v1212_v20 = vpack.c.b16 %v1210_v17, %v1210_v17  ;;  %v1211_v27 = vpack.c.b16 %v1208_v14, %v1208_v14  ;;  %v1542_v32 = vsel %vm1207_vm0, %v1541_v16, %v1540_v15  ;;  %v5983_v57 = vsel %vm1207_vm0, %v2655_v46, %v2836_v51  ;;  %v5228_v15 = vld [vmem:[#allocation7 + $0x220] sm:$0xff]   ;;  %v5230_v16 = vld [vmem:[#allocation7 + $0x28] sm:$0xff]  }
 0x27f   :  { %v1354_v25 = vsel %vm1207_vm0, %v1353_v18, %v1203_v31  ;;  %v1545_v28 = vsel %vm1207_vm0, %v1544_v48, %v1543_v19  ;;  %v1917_v35 = vsel %vm1207_vm0, %v1916_v23, %v1915_v22  ;;  %v1546_v37 = vpack.c.b16 %v1542_v32, %v1542_v32  ;;  %v5224_v31 = vld [vmem:[#allocation7 + $0x218] sm:$0xff]   ;;  %v5231_v17 = vld [vmem:[#allocation7 + $0x268] sm:$0xff]   ;;  %v5233_v18 = vld [vmem:[#allocation7 + $0x70] sm:$0xff]  }
 0x280   :  { %1343 = vmatprep.mubr.bf16.mxu0 %v1212_v20  ;;  %v1356_v10 = vpack.c.b16 %v1354_v25, %v1354_v25  ;;  %v1547_v34 = vpack.c.b16 %v1545_v28, %v1545_v28  ;;  %v1919_v41 = vpack.c.b16 %v1917_v35, %v1917_v35  ;;  %v5990_v14 = vsel %vm1207_vm0, %v2654_v55, %v2834_v0  ;;  %v5992_v19 = vld [vmem:[#allocation3 + $0x10] sm:$0x4]  ;;  %v5232_v48 = vld [vmem:[#allocation7 + $0x228] sm:$0xff]   ;;  %v5994_v20 = vld [vmem:[#allocation3 + $0x18] sm:$0x8] }
 0x281   :  { %1344 = vmatmul.mubr.bf16.vlgmr.msra.gmra.mrb[4].mxu0 %v1211_v27  ;;  %v5235_v22 = vld [vmem:[#allocation7 + $0x270] sm:$0xff]   ;;  %v5996_v23 = vld [vmem:[#allocation3] sm:$0x4]  ;;  %v5237_v27 = vld [vmem:[#allocation7 + $0x78] sm:$0xff]   ;;  %v1910_v25 = vunpack.c.l.b16 %v5992_v19  ;;  %v1351_v32 = vrot.slane %v1204_v4, 7  ;;  %v2095_v2 = vrot.slane %v1909_v8, 5 }
 0x282   :  { %4663 = vmatpush3.bf16.msra.mxu0 %v5210_v21  ;;  %1487 = vmatprep.mubr.bf16.mxu0 %v1356_v10  ;;  %v5234_v21 = vld [vmem:[#allocation7 + $0x30] sm:$0xff]   ;;  %v5999_v28 = vld [vmem:[#allocation3 + $0x8] sm:$0x8]  ;;  %v1908_v35 = vunpack.c.l.b16 %v5996_v23  ;;  %v5244_v51 = vld [vmem:[#allocation7 + $0x300] sm:$0xff]  }
 0x283   :  { %1678 = vmatprep.mubr.bf16.mxu1 %v1547_v34  ;;  %4664 = vmatprep.subr.bf16.mxu0 %v5213_v33  ;;  %v2283_v33 = vunpack.c.l.b16 %v5994_v20  ;;  %v5236_v10 = vld [vmem:[#allocation7 + $0x230] sm:$0xff]   ;;  %v1724_v34 = vrot.slane %v1539_v12, 2  ;;  %v1913_v4 = vrot.slane %v1910_v25, 3  ;;  %v1352_v5 = vsel %vm1207_vm0, %v1351_v32, %v1202_v58  ;;  %v5243_v58 = vld [vmem:[#allocation7 + $0x340] sm:$0xff]   ;;  %v5261_v32 = vld [vmem:[#allocation7 + $0x1e8] sm:$0xff]  }
 0x284   :  { %1679 = vmatmul.mubr.bf16.vlgmr.msra.gmra.mrb[8].mxu1 %v1546_v37  ;;  %v5239_v37 = vld [vmem:[#allocation7 + $0x278] sm:$0xff]   ;;  %v5249_v0 = vld [vmem:[#allocation7 + $0x1d0] sm:$0xff]  }
 0x285   :  { %4729 = vmatpush3.bf16.msra.mxu1 %v5212_v36  ;;  %2050 = vmatprep.mubr.bf16.mxu1 %v1919_v41  ;;  %v5238_v36 = vld [vmem:[#allocation7 + $0x38] sm:$0xff]   ;;  %v2288_v12 = vrot.slane %v2283_v33, 5 }
 0x286   :  { %4665 = vmatpush3.bf16.msra.mxu0 %v5214_v38  ;;  %4730 = vmatprep.subr.bf16.mxu1 %v5215_v39  ;;  %v2281_v38 = vunpack.c.l.b16 %v5999_v28  ;;  %v5241_v39 = vld [vmem:[#allocation7 + $0x1c0] sm:$0xff]   ;;  %v5240_v41 = vld [vmem:[#allocation7 + $0x238] sm:$0xff]  }
 0x287   :  { %4666 = vmatprep.subr.bf16.mxu0 %v5217_v42  ;;  %v1725_v42 = vsel %vm1207_vm0, %v1724_v34, %v1723_v63  ;;  %v5262_v34 = vld [vmem:[#allocation7 + $0x1a8] sm:$0xff]  }
 0x288   :  { %v2287_v1 = vrot.slane %v2281_v38, 6  ;;  %v5264_v63 = vld [vmem:[#allocation7 + $0x328] sm:$0xff]   ;;  %v2467_v19 = vrot.slane %v2281_v38, 7 }
 0x289   :  { %4731 = vmatpush3.bf16.msra.mxu1 %v5216_v30  ;;  %v1912_v30 = vrot.slane %v1908_v35, 4  ;;  %v5309_v38 = vld [vmem:[#allocation7 + $0x3c8] sm:$0xff]  }
 0x28a   :  { %4667 = vmatpush3.bf16.msra.mxu0 %v5218_v44  ;;  %4732 = vmatprep.subr.bf16.mxu1 %v5219_v45  ;;  %v1355_v44 = vpack.c.b16 %v1352_v5, %v1352_v5  ;;  %v5245_v45 = vld [vmem:[#allocation7 + $0x1c8] sm:$0xff]   ;;  %v5267_v5 = vld [vmem:[#allocation7 + $0x370] sm:$0xff]  }
 0x28b   :  { %4668 = vmatprep.subr.bf16.mxu0 %v5221_v29  ;;  %v1914_v56 = vsel %vm1207_vm0, %v1913_v4, %v1912_v30  ;;  %v1727_v29 = vpack.c.b16 %v1725_v42, %v1725_v42  ;;  %v5266_v4 = vld [vmem:[#allocation7 + $0x1b0] sm:$0xff]   ;;  %v1721_v30 = vrot.slane %v1538_v6, 2 }
 0x28d   :  { %4733 = vmatpush3.bf16.msra.mxu1 %v5220_v49  ;;  %v2289_v49 = vsel %vm1207_vm0, %v2288_v12, %v2287_v1  ;;  %v6026_v12 = vld [vmem:[#allocation3] sm:$0x8]  ;;  %v2096_v1 = vrot.slane %v1911_v13, 4  ;;  %v2658_v13 = vrot.slane %v2655_v46, 7 }
 0x28e   :  { %4669 = vmatpush3.bf16.msra.mxu0 %v5222_v52  ;;  %4734 = vmatprep.subr.bf16.mxu1 %v5223_v53  ;;  %v1918_v52 = vpack.c.b16 %v1914_v56, %v1914_v56  ;;  %v5246_v53 = vld [vmem:[#allocation7 + $0x188] sm:$0xff]   ;;  %v5270_v56 = vld [vmem:[#allocation7 + $0x1b8] sm:$0xff]   ;;  %v5276_v46 = vld [vmem:[#allocation7 + $0x400] sm:$0xff]  }
 0x28f   :  { %4670 = vmatprep.subr.bf16.mxu0 %v5225_v54  ;;  %v5247_v54 = vld [vmem:[#allocation7 + $0x348] sm:$0xff]   ;;  %v2659_v26 = vsel %vm1207_vm0, %v2658_v13, %v2653_v43  ;;  %v5283_v43 = vld [vmem:[#allocation7 + $0x450] sm:$0xff]  }
 0x291   :  { %4735 = vmatpush3.bf16.msra.mxu1 %v5224_v31  ;;  %v2291_v31 = vpack.c.b16 %v2289_v49, %v2289_v49  ;;  %v5272_v49 = vld [vmem:[#allocation7 + $0x338] sm:$0xff]  }
 0x292   :  { %4671 = vmatpush3.bf16.msra.mxu0 %v5226_v3  ;;  %4736 = vmatprep.subr.bf16.mxu1 %v5227_v9  ;;  %v5248_v3 = vld [vmem:[#allocation7 + $0x308] sm:$0xff]   ;;  %v5250_v9 = vld [vmem:[#allocation7 + $0x190] sm:$0xff]  }
 0x293   :  { %4672 = vmatprep.subr.bf16.mxu0 %v5229_v11  ;;  %v5251_v11 = vld [vmem:[#allocation7 + $0x350] sm:$0xff]  }
 0x295   :  { %4737 = vmatpush3.bf16.msra.mxu1 %v5228_v15  ;;  %v5253_v15 = vld [vmem:[#allocation7 + $0x1d8] sm:$0xff]  }
 0x296   :  { %4673 = vmatpush3.bf16.msra.mxu0 %v5230_v16  ;;  %4738 = vmatprep.subr.bf16.mxu1 %v5231_v17  ;;  %v5252_v16 = vld [vmem:[#allocation7 + $0x310] sm:$0xff]   ;;  %v5254_v17 = vld [vmem:[#allocation7 + $0x198] sm:$0xff]  }
 0x297   :  { %4674 = vmatprep.subr.bf16.mxu0 %v5233_v18  ;;  %v5255_v18 = vld [vmem:[#allocation7 + $0x358] sm:$0xff]  }
 0x299   :  { %4739 = vmatpush3.bf16.msra.mxu1 %v5232_v48  ;;  %v5257_v48 = vld [vmem:[#allocation7 + $0x1e0] sm:$0xff]  }
 0x29a   :  { %4675 = vmatpush3.bf16.msra.mxu0 %v5234_v21  ;;  %4740 = vmatprep.subr.bf16.mxu1 %v5235_v22  ;;  %v5256_v21 = vld [vmem:[#allocation7 + $0x318] sm:$0xff]   ;;  %v5258_v22 = vld [vmem:[#allocation7 + $0x1a0] sm:$0xff]  }
 0x29b   :  { %4676 = vmatprep.subr.bf16.mxu0 %v5237_v27  ;;  %v5259_v27 = vld [vmem:[#allocation7 + $0x360] sm:$0xff]  }
 0x29d   :  { %4741 = vmatpush3.bf16.msra.mxu1 %v5236_v10  ;;  %v5260_v10 = vld [vmem:[#allocation7 + $0x320] sm:$0xff]  }
 0x29e   :  { %4677 = vmatpush3.bf16.msra.mxu0 %v5238_v36  ;;  %4742 = vmatprep.subr.bf16.mxu1 %v5239_v37  ;;  %v5263_v36 = vld [vmem:[#allocation7 + $0x368] sm:$0xff]   ;;  %v5265_v37 = vld [vmem:[#allocation7 + $0x1f0] sm:$0xff]  }
 0x29f   :  { %4706 = vmatprep.subr.bf16.mxu0 %v5241_v39  ;;  %v6024_v39 = vld [vmem:[#allocation3 + $0x10] sm:$0x8] }
 0x2a0   :  { %v2282_v42 = vunpack.c.l.b16 %v6024_v39 }
 0x2a1   :  { %4743 = vmatpush3.bf16.msra.mxu1 %v5240_v41  ;;  %1488 = vmatmul.mubr.bf16.vlgmr.msra.gmra.mrb[8].mxu0 %v1355_v44  ;;  %v5269_v41 = vld [vmem:[#allocation7 + $0x1f8] sm:$0xff]   ;;  %v2280_v44 = vunpack.c.l.b16 %v6026_v12  ;;  %v5338_v12 = vld [vmem:[#allocation7 + $0x480] sm:$0xff]  }
 0x2a2   :  { %4707 = vmatpush3.bf16.msra.mxu0 %v5242_v60  ;;  %1858 = vmatprep.mubr.bf16.mxu0 %v1727_v29  ;;  %v5268_v60 = vld [vmem:[#allocation7 + $0x330] sm:$0xff]   ;;  %v5273_v29 = vld [vmem:[#allocation7 + $0x2c0] sm:$0xff]   ;;  %v2285_v6 = vrot.slane %v2282_v42, 5 }
 0x2a3   :  { %4772 = vmatprep.subr.bf16.mxu1 %v5243_v58  ;;  %4708 = vmatprep.subr.bf16.mxu0 %v5245_v45  ;;  %v5271_v58 = vld [vmem:[#allocation7 + $0x378] sm:$0xff]   ;;  %v1720_v45 = vrot.slane %v1536_v62, 3  ;;  %v2284_v59 = vrot.slane %v2280_v44, 6  ;;  %v5274_v62 = vld [vmem:[#allocation7 + $0x280] sm:$0xff]  }
 0x2a4   :  { %2051 = vmatmul.mubr.bf16.vlgmr.msra.gmra.mrb[12].mxu1 %v1918_v52  ;;  %v5275_v52 = vld [vmem:[#allocation7 + $0x440] sm:$0xff]  }
 0x2a5   :  { %4773 = vmatpush3.bf16.msra.mxu1 %v5244_v51  ;;  %2422 = vmatprep.mubr.bf16.mxu1 %v2291_v31  ;;  %v1722_v7 = vsel %vm1207_vm0, %v1721_v30, %v1720_v45  ;;  %v2097_v51 = vsel %vm1207_vm0, %v2096_v1, %v2095_v2  ;;  %v2286_v8 = vsel %vm1207_vm0, %v2285_v6, %v2284_v59  ;;  %v5299_v30 = vld [vmem:[#allocation7 + $0x470] sm:$0xff]   ;;  %v6052_v1 = vld [vmem:[#allocation3 + $0x8] sm:$0x20]  ;;  %v5302_v2 = vld [vmem:[#allocation7 + $0x2b8] sm:$0xff]  }
 0x2a6   :  { %4709 = vmatpush3.bf16.msra.mxu0 %v5246_v53  ;;  %4774 = vmatprep.subr.bf16.mxu1 %v5247_v54  ;;  %v1726_v61 = vpack.c.b16 %v1722_v7, %v1722_v7  ;;  %v5277_v53 = vld [vmem:[#allocation7 + $0x2c8] sm:$0xff]   ;;  %v2099_v54 = vpack.c.b16 %v2097_v51, %v2097_v51  ;;  %v2290_v31 = vpack.c.b16 %v2286_v8, %v2286_v8  ;;  %v5300_v45 = vld [vmem:[#allocation7 + $0x430] sm:$0xff]   ;;  %v5303_v6 = vld [vmem:[#allocation7 + $0x478] sm:$0xff]   ;;  %v2092_v7 = vrot.slane %v1908_v35, 5 }
 0x2a7   :  { %4710 = vmatprep.subr.bf16.mxu0 %v5249_v0  ;;  %v5278_v0 = vld [vmem:[#allocation7 + $0x288] sm:$0xff]   ;;  %v3021_v13 = vunpack.c.h.b16 %v6052_v1  ;;  %v5304_v51 = vld [vmem:[#allocation7 + $0x438] sm:$0xff]   ;;  %v5306_v35 = vld [vmem:[#allocation7 + $0x380] sm:$0xff]  }
 0x2a8   :  { %v5308_v8 = vld [vmem:[#allocation7 + $0x500] sm:$0xff]  }
 0x2a9   :  { %4775 = vmatpush3.bf16.msra.mxu1 %v5248_v3  ;;  %v5279_v3 = vld [vmem:[#allocation7 + $0x448] sm:$0xff]   ;;  %v3027_v59 = vrot.slane %v3021_v13, 2 }
 0x2aa   :  { %4711 = vmatpush3.bf16.msra.mxu0 %v5250_v9  ;;  %4776 = vmatprep.subr.bf16.mxu1 %v5251_v11  ;;  %v2661_v9 = vpack.c.b16 %v2659_v26, %v2659_v26  ;;  %v5281_v11 = vld [vmem:[#allocation7 + $0x2d0] sm:$0xff]  }
 0x2ab   :  { %4712 = vmatprep.subr.bf16.mxu0 %v5253_v15  ;;  %v5280_v15 = vld [vmem:[#allocation7 + $0x408] sm:$0xff]  }
 0x2ad   :  { %4777 = vmatpush3.bf16.msra.mxu1 %v5252_v16  ;;  %v5285_v16 = vld [vmem:[#allocation7 + $0x2d8] sm:$0xff]  }
 0x2ae   :  { %4713 = vmatpush3.bf16.msra.mxu0 %v5254_v17  ;;  %4778 = vmatprep.subr.bf16.mxu1 %v5255_v18  ;;  %v5284_v17 = vld [vmem:[#allocation7 + $0x410] sm:$0xff]   ;;  %v5286_v18 = vld [vmem:[#allocation7 + $0x298] sm:$0xff]  }
 0x2af   :  { %4714 = vmatprep.subr.bf16.mxu0 %v5257_v48  ;;  %v5287_v48 = vld [vmem:[#allocation7 + $0x458] sm:$0xff]  }
 0x2b1   :  { %4779 = vmatpush3.bf16.msra.mxu1 %v5256_v21  ;;  %v5289_v21 = vld [vmem:[#allocation7 + $0x2e0] sm:$0xff]  }
 0x2b2   :  { %4715 = vmatpush3.bf16.msra.mxu0 %v5258_v22  ;;  %4780 = vmatprep.subr.bf16.mxu1 %v5259_v27  ;;  %v5288_v22 = vld [vmem:[#allocation7 + $0x418] sm:$0xff]   ;;  %v5290_v27 = vld [vmem:[#allocation7 + $0x2a0] sm:$0xff]  }
 0x2b3   :  { %4716 = vmatprep.subr.bf16.mxu0 %v5261_v32  ;;  %v5291_v32 = vld [vmem:[#allocation7 + $0x460] sm:$0xff]  }
 0x2b5   :  { %4781 = vmatpush3.bf16.msra.mxu1 %v5260_v10  ;;  %v5293_v10 = vld [vmem:[#allocation7 + $0x2e8] sm:$0xff]  }
 0x2b6   :  { %4717 = vmatpush3.bf16.msra.mxu0 %v5262_v34  ;;  %4782 = vmatprep.subr.bf16.mxu1 %v5263_v36  ;;  %v5292_v34 = vld [vmem:[#allocation7 + $0x420] sm:$0xff]   ;;  %v5294_v36 = vld [vmem:[#allocation7 + $0x2a8] sm:$0xff]  }
 0x2b7   :  { %4718 = vmatprep.subr.bf16.mxu0 %v5265_v37  ;;  %v5295_v37 = vld [vmem:[#allocation7 + $0x468] sm:$0xff]  }
 0x2b9   :  { %4783 = vmatpush3.bf16.msra.mxu1 %v5264_v63  ;;  %v5297_v63 = vld [vmem:[#allocation7 + $0x2f0] sm:$0xff]  }
 0x2ba   :  { %4719 = vmatpush3.bf16.msra.mxu0 %v5266_v4  ;;  %4784 = vmatprep.subr.bf16.mxu1 %v5267_v5  ;;  %v5296_v4 = vld [vmem:[#allocation7 + $0x428] sm:$0xff]   ;;  %v6050_v5 = vld [vmem:[#allocation3 + $0x18] sm:$0x20] }
 0x2bb   :  { %4720 = vmatprep.subr.bf16.mxu0 %v5269_v41  ;;  %v5298_v41 = vld [vmem:[#allocation7 + $0x2b0] sm:$0xff]  }
 0x2bd   :  { %4785 = vmatpush3.bf16.msra.mxu1 %v5268_v60  ;;  %v5301_v60 = vld [vmem:[#allocation7 + $0x2f8] sm:$0xff]  }
 0x2be   :  { %4721 = vmatpush3.bf16.msra.mxu0 %v5270_v56  ;;  %4786 = vmatprep.subr.bf16.mxu1 %v5271_v58  ;;  %v2093_v56 = vrot.slane %v1910_v25, 4  ;;  %v3023_v58 = vunpack.c.h.b16 %v6050_v5  ;;  %v2656_v25 = vrot.slane %v2654_v55, 7  ;;  %v5307_v55 = vld [vmem:[#allocation7 + $0x540] sm:$0xff]  }
 0x2bf   :  { %4750 = vmatprep.subr.bf16.mxu0 %v5273_v29  ;;  %v2468_v29 = vrot.slane %v2283_v33, 6 }
 0x2c0   :  { %v2094_v20 = vsel %vm1207_vm0, %v2093_v56, %v2092_v7  ;;  %v3028_v33 = vrot.slane %v3023_v58, 1  ;;  %v2657_v47 = vsel %vm1207_vm0, %v2656_v25, %v2652_v50  ;;  %v5314_v50 = vld [vmem:[#allocation7 + $0x390] sm:$0xff]   ;;  %v5336_v25 = vld [vmem:[#allocation7 + $0x538] sm:$0xff]  }
 0x2c1   :  { %4787 = vmatpush3.bf16.msra.mxu1 %v5272_v49  ;;  %1859 = vmatmul.mubr.bf16.vlgmr.msra.gmra.mrb[12].mxu0 %v1726_v61  ;;  %v5305_v49 = vld [vmem:[#allocation7 + $0x3c0] sm:$0xff]   ;;  %v2469_v23 = vsel %vm1207_vm0, %v2468_v29, %v2467_v19  ;;  %v2098_v28 = vpack.c.b16 %v2094_v20, %v2094_v20  ;;  %v5332_v56 = vld [vmem:[#allocation7 + $0x530] sm:$0xff]   ;;  %v5334_v29 = vld [vmem:[#allocation7 + $0x3b8] sm:$0xff]  }
 0x2c2   :  { %4751 = vmatpush3.bf16.msra.mxu0 %v5274_v62  ;;  %2230 = vmatprep.mubr.bf16.mxu0 %v2099_v54  ;;  %v2471_v62 = vpack.c.b16 %v2469_v23, %v2469_v23  ;;  %v3029_v61 = vsel %vm1207_vm0, %v3028_v33, %v3027_v59  ;;  %v5311_v54 = vld [vmem:[#allocation7 + $0x548] sm:$0xff]   ;;  %v5339_v23 = vld [vmem:[#allocation7 + $0x640] sm:$0xff]   ;;  %v2839_v59 = vpack.c.b16 %v5983_v57, %v5983_v57  ;;  %v5346_v57 = vld [vmem:[#allocation7 + $0x490] sm:$0xff]  }
 0x2c3   :  { %4816 = vmatprep.subr.bf16.mxu1 %v5275_v52  ;;  %4752 = vmatprep.subr.bf16.mxu0 %v5277_v53  ;;  %v2660_v52 = vpack.c.b16 %v2657_v47, %v2657_v47  ;;  %v5310_v53 = vld [vmem:[#allocation7 + $0x388] sm:$0xff]   ;;  %v3031_v26 = vpack.c.b16 %v3029_v61, %v3029_v61  ;;  %v5340_v47 = vld [vmem:[#allocation7 + $0x600] sm:$0xff]  }
 0x2c4   :  { %2423 = vmatmul.mubr.bf16.vlgmr.msra.gmra.mrb[16].mxu1 %v2290_v31  ;;  %v5315_v31 = vld [vmem:[#allocation7 + $0x550] sm:$0xff]  }
 0x2c5   :  { %4817 = vmatpush3.bf16.msra.mxu1 %v5276_v46  ;;  %2792 = vmatprep.mubr.bf16.mxu1 %v2661_v9  ;;  %v5313_v46 = vld [vmem:[#allocation7 + $0x3d0] sm:$0xff]   ;;  %v5318_v9 = vld [vmem:[#allocation7 + $0x398] sm:$0xff]  }
 0x2c6   :  { %4753 = vmatpush3.bf16.msra.mxu0 %v5278_v0  ;;  %4818 = vmatprep.subr.bf16.mxu1 %v5279_v3  ;;  %v5317_v0 = vld [vmem:[#allocation7 + $0x3d8] sm:$0xff]   ;;  %v5316_v3 = vld [vmem:[#allocation7 + $0x510] sm:$0xff]  }
 0x2c7   :  { %4754 = vmatprep.subr.bf16.mxu0 %v5281_v11  ;;  %v5319_v11 = vld [vmem:[#allocation7 + $0x558] sm:$0xff]  }
 0x2c9   :  { %4819 = vmatpush3.bf16.msra.mxu1 %v5280_v15  ;;  %v5321_v15 = vld [vmem:[#allocation7 + $0x3e0] sm:$0xff]  }
 0x2ca   :  { %4755 = vmatpush3.bf16.msra.mxu0 %v5282_v40  ;;  %4820 = vmatprep.subr.bf16.mxu1 %v5283_v43  ;;  %v5320_v40 = vld [vmem:[#allocation7 + $0x518] sm:$0xff]   ;;  %v5322_v43 = vld [vmem:[#allocation7 + $0x3a0] sm:$0xff]  }
 0x2cb   :  { %4756 = vmatprep.subr.bf16.mxu0 %v5285_v16  ;;  %v5323_v16 = vld [vmem:[#allocation7 + $0x560] sm:$0xff]  }
 0x2cd   :  { %4821 = vmatpush3.bf16.msra.mxu1 %v5284_v17  ;;  %v5325_v17 = vld [vmem:[#allocation7 + $0x3e8] sm:$0xff]  }
 0x2ce   :  { %4757 = vmatpush3.bf16.msra.mxu0 %v5286_v18  ;;  %4822 = vmatprep.subr.bf16.mxu1 %v5287_v48  ;;  %v5324_v18 = vld [vmem:[#allocation7 + $0x520] sm:$0xff]   ;;  %v5326_v48 = vld [vmem:[#allocation7 + $0x3a8] sm:$0xff]  }
 0x2cf   :  { %4758 = vmatprep.subr.bf16.mxu0 %v5289_v21  ;;  %v5327_v21 = vld [vmem:[#allocation7 + $0x568] sm:$0xff]  }
 0x2d1   :  { %4823 = vmatpush3.bf16.msra.mxu1 %v5288_v22  ;;  %v5329_v22 = vld [vmem:[#allocation7 + $0x3f0] sm:$0xff]  }
 0x2d2   :  { %4759 = vmatpush3.bf16.msra.mxu0 %v5290_v27  ;;  %4824 = vmatprep.subr.bf16.mxu1 %v5291_v32  ;;  %v6076_v27 = vld [vmem:[#allocation3 + $0x10] sm:$0x20]  ;;  %v5328_v32 = vld [vmem:[#allocation7 + $0x528] sm:$0xff]  }
 0x2d3   :  { %4760 = vmatprep.subr.bf16.mxu0 %v5293_v10  ;;  %v6078_v10 = vld [vmem:[#allocation3 + $0x18] sm:$0x40] }
 0x2d5   :  { %4825 = vmatpush3.bf16.msra.mxu1 %v5292_v34  ;;  %v5330_v34 = vld [vmem:[#allocation7 + $0x3b0] sm:$0xff]  }
 0x2d6   :  { %4761 = vmatpush3.bf16.msra.mxu0 %v5294_v36  ;;  %4826 = vmatprep.subr.bf16.mxu1 %v5295_v37  ;;  %v5331_v36 = vld [vmem:[#allocation7 + $0x570] sm:$0xff]   ;;  %v6080_v37 = vld [vmem:[#allocation3] sm:$0x20] }
 0x2d7   :  { %4762 = vmatprep.subr.bf16.mxu0 %v5297_v63  ;;  %v5333_v63 = vld [vmem:[#allocation7 + $0x3f8] sm:$0xff]  }
 0x2d9   :  { %4827 = vmatpush3.bf16.msra.mxu1 %v5296_v4  ;;  %v3022_v4 = vunpack.c.h.b16 %v6076_v27 }
 0x2da   :  { %4763 = vmatpush3.bf16.msra.mxu0 %v5298_v41  ;;  %4828 = vmatprep.subr.bf16.mxu1 %v5299_v30  ;;  %v6083_v41 = vld [vmem:[#allocation3 + $0x8] sm:$0x40]  ;;  %v2465_v30 = vrot.slane %v2282_v42, 6 }
 0x2db   :  { %4764 = vmatprep.subr.bf16.mxu0 %v5301_v60  ;;  %v3395_v60 = vunpack.c.h.b16 %v6078_v10  ;;  %v3393_v7 = vunpack.c.h.b16 %v6083_v41  ;;  %v3025_v39 = vrot.slane %v3022_v4, 1 }
 0x2dd   :  { %4829 = vmatpush3.bf16.msra.mxu1 %v5300_v45  ;;  %v3020_v45 = vunpack.c.h.b16 %v6080_v37  ;;  %v3400_v19 = vrot.slane %v3395_v60, 3  ;;  %v3579_v27 = vrot.slane %v3393_v7, 5  ;;  %v5402_v37 = vld [vmem:[#allocation7 + $0x680] sm:$0xff]  }
 0x2de   :  { %4765 = vmatpush3.bf16.msra.mxu0 %v5302_v2  ;;  %4830 = vmatprep.subr.bf16.mxu1 %v5303_v6  ;;  %v5335_v2 = vld [vmem:[#allocation7 + $0x578] sm:$0xff]   ;;  %v2464_v6 = vrot.slane %v2280_v44, 7  ;;  %v3399_v44 = vrot.slane %v3393_v7, 4  ;;  %v5403_v7 = vld [vmem:[#allocation7 + $0x6c8] sm:$0xff]  }
 0x2df   :  { %4794 = vmatprep.subr.bf16.mxu0 %v5305_v49  ;;  %v5337_v49 = vld [vmem:[#allocation7 + $0x4c0] sm:$0xff]   ;;  %v3024_v20 = vrot.slane %v3020_v45, 2 }
 0x2e0   :  { %v2466_v42 = vsel %vm1207_vm0, %v2465_v30, %v2464_v6  ;;  %v5364_v30 = vld [vmem:[#allocation7 + $0x630] sm:$0xff]   ;;  %v5367_v6 = vld [vmem:[#allocation7 + $0x678] sm:$0xff]  }
 0x2e1   :  { %4831 = vmatpush3.bf16.msra.mxu1 %v5304_v51  ;;  %2231 = vmatmul.mubr.bf16.vlgmr.msra.gmra.mrb[16].mxu0 %v2098_v28  ;;  %v2470_v33 = vpack.c.b16 %v2466_v42, %v2466_v42  ;;  %v3026_v51 = vsel %vm1207_vm0, %v3025_v39, %v3024_v20  ;;  %v3401_v28 = vsel %vm1207_vm0, %v3400_v19, %v3399_v44  ;;  %v5369_v39 = vld [vmem:[#allocation7 + $0x5c0] sm:$0xff]   ;;  %v3207_v42 = vrot.slane %v3021_v13, 3 }
 0x2e2   :  { %4795 = vmatpush3.bf16.msra.mxu0 %v5306_v35  ;;  %2602 = vmatprep.mubr.bf16.mxu0 %v2471_v62  ;;  %v5341_v35 = vld [vmem:[#allocation7 + $0x4c8] sm:$0xff]   ;;  %v3403_v61 = vpack.c.b16 %v3401_v28, %v3401_v28  ;;  %v2838_v13 = vpack.c.b16 %v5990_v14, %v5990_v14  ;;  %v5377_v14 = vld [vmem:[#allocation7 + $0x5d0] sm:$0xff]  }
 0x2e3   :  { %4860 = vmatprep.subr.bf16.mxu1 %v5307_v55  ;;  %4796 = vmatprep.subr.bf16.mxu0 %v5309_v38  ;;  %v3030_v55 = vpack.c.b16 %v3026_v51, %v3026_v51  ;;  %v5342_v38 = vld [vmem:[#allocation7 + $0x488] sm:$0xff]  }
 0x2e4   :  { %2793 = vmatmul.mubr.bf16.vlgmr.msra.gmra.mrb[20].mxu1 %v2660_v52  ;;  %v5343_v62 = vld [vmem:[#allocation7 + $0x648] sm:$0xff]  }
 0x2e5   :  { %4861 = vmatpush3.bf16.msra.mxu1 %v5308_v8  ;;  %3162 = vmatprep.mubr.bf16.mxu1 %v3031_v26  ;;  %v5345_v8 = vld [vmem:[#allocation7 + $0x4d0] sm:$0xff]   ;;  %v5344_v52 = vld [vmem:[#allocation7 + $0x608] sm:$0xff]  }
 0x2e6   :  { %4797 = vmatpush3.bf16.msra.mxu0 %v5310_v53  ;;  %4862 = vmatprep.subr.bf16.mxu1 %v5311_v54  ;;  %v5347_v53 = vld [vmem:[#allocation7 + $0x650] sm:$0xff]   ;;  %v5349_v54 = vld [vmem:[#allocation7 + $0x4d8] sm:$0xff]   ;;  %v5373_v51 = vld [vmem:[#allocation7 + $0x5c8] sm:$0xff]  }
 0x2e7   :  { %4798 = vmatprep.subr.bf16.mxu0 %v5313_v46  ;;  %v5348_v26 = vld [vmem:[#allocation7 + $0x610] sm:$0xff]   ;;  %v5350_v46 = vld [vmem:[#allocation7 + $0x498] sm:$0xff]  }
 0x2e9   :  { %4863 = vmatpush3.bf16.msra.mxu1 %v5312_v24  ;;  %v5351_v24 = vld [vmem:[#allocation7 + $0x658] sm:$0xff]  }
 0x2ea   :  { %4799 = vmatpush3.bf16.msra.mxu0 %v5314_v50  ;;  %4864 = vmatprep.subr.bf16.mxu1 %v5315_v31  ;;  %v5353_v50 = vld [vmem:[#allocation7 + $0x4e0] sm:$0xff]   ;;  %v5352_v31 = vld [vmem:[#allocation7 + $0x618] sm:$0xff]  }
 0x2eb   :  { %4800 = vmatprep.subr.bf16.mxu0 %v5317_v0  ;;  %v5354_v0 = vld [vmem:[#allocation7 + $0x4a0] sm:$0xff]  }
 0x2ed   :  { %4865 = vmatpush3.bf16.msra.mxu1 %v5316_v3  ;;  %v5355_v3 = vld [vmem:[#allocation7 + $0x660] sm:$0xff]  }
 0x2ee   :  { %4801 = vmatpush3.bf16.msra.mxu0 %v5318_v9  ;;  %4866 = vmatprep.subr.bf16.mxu1 %v5319_v11  ;;  %v5357_v9 = vld [vmem:[#allocation7 + $0x4e8] sm:$0xff]   ;;  %v5356_v11 = vld [vmem:[#allocation7 + $0x620] sm:$0xff]  }
 0x2ef   :  { %4802 = vmatprep.subr.bf16.mxu0 %v5321_v15  ;;  %v5358_v15 = vld [vmem:[#allocation7 + $0x4a8] sm:$0xff]  }
 0x2f1   :  { %4867 = vmatpush3.bf16.msra.mxu1 %v5320_v40  ;;  %v5359_v40 = vld [vmem:[#allocation7 + $0x668] sm:$0xff]  }
 0x2f2   :  { %4803 = vmatpush3.bf16.msra.mxu0 %v5322_v43  ;;  %4868 = vmatprep.subr.bf16.mxu1 %v5323_v16  ;;  %v5361_v43 = vld [vmem:[#allocation7 + $0x4f0] sm:$0xff]  }
 0x2f3   :  { %4804 = vmatprep.subr.bf16.mxu0 %v5325_v17  ;;  %v6105_v16 = vld [vmem:[#allocation3 + $0x10] sm:$0x40]  ;;  %v5360_v17 = vld [vmem:[#allocation7 + $0x628] sm:$0xff]  }
 0x2f5   :  { %4869 = vmatpush3.bf16.msra.mxu1 %v5324_v18  ;;  %v6107_v18 = vld [vmem:[#allocation3 + $0x18] sm:$0x80] }
 0x2f6   :  { %4805 = vmatpush3.bf16.msra.mxu0 %v5326_v48  ;;  %4870 = vmatprep.subr.bf16.mxu1 %v5327_v21  ;;  %v5362_v48 = vld [vmem:[#allocation7 + $0x4b0] sm:$0xff]  }
 0x2f7   :  { %4806 = vmatprep.subr.bf16.mxu0 %v5329_v22  ;;  %v5363_v21 = vld [vmem:[#allocation7 + $0x670] sm:$0xff]   ;;  %v6109_v22 = vld [vmem:[#allocation3] sm:$0x40] }
 0x2f9   :  { %4871 = vmatpush3.bf16.msra.mxu1 %v5328_v32  ;;  %v5365_v32 = vld [vmem:[#allocation7 + $0x4f8] sm:$0xff]  }
 0x2fa   :  { %4807 = vmatpush3.bf16.msra.mxu0 %v5330_v34  ;;  %4872 = vmatprep.subr.bf16.mxu1 %v5331_v36  ;;  %v3394_v34 = vunpack.c.h.b16 %v6105_v16  ;;  %v6112_v36 = vld [vmem:[#allocation3 + $0x8] sm:$0x80] }
 0x2fb   :  { %4808 = vmatprep.subr.bf16.mxu0 %v5333_v63  ;;  %v3767_v63 = vunpack.c.h.b16 %v6107_v18  ;;  %v5419_v18 = vld [vmem:[#allocation7 + $0x7c8] sm:$0xff]  }
 0x2fc   :  { %v3397_v19 = vrot.slane %v3394_v34, 3 }
 0x2fd   :  { %4873 = vmatpush3.bf16.msra.mxu1 %v5332_v56  ;;  %v3208_v56 = vrot.slane %v3023_v58, 2  ;;  %v3772_v5 = vrot.slane %v3767_v63, 5  ;;  %v5368_v58 = vld [vmem:[#allocation7 + $0x638] sm:$0xff]  }
 0x2fe   :  { %4809 = vmatpush3.bf16.msra.mxu0 %v5334_v29  ;;  %4874 = vmatprep.subr.bf16.mxu1 %v5335_v2  ;;  %v3392_v29 = vunpack.c.h.b16 %v6109_v22  ;;  %v5366_v2 = vld [vmem:[#allocation7 + $0x4b8] sm:$0xff]   ;;  %v5420_v22 = vld [vmem:[#allocation7 + $0x788] sm:$0xff]  }
 0x2ff   :  { %4838 = vmatprep.subr.bf16.mxu0 %v5337_v49  ;;  %v3765_v49 = vunpack.c.h.b16 %v6112_v36  ;;  %v5423_v36 = vld [vmem:[#allocation7 + $0x7d8] sm:$0xff]  }
 0x300   :  { %v3396_v20 = vrot.slane %v3392_v29, 4 }
 0x301   :  { %4875 = vmatpush3.bf16.msra.mxu1 %v5336_v25  ;;  %2603 = vmatmul.mubr.bf16.vlgmr.msra.gmra.mrb[20].mxu0 %v2470_v33  ;;  %v3209_v25 = vsel %vm1207_vm0, %v3208_v56, %v3207_v42  ;;  %v3771_v1 = vrot.slane %v3765_v49, 6  ;;  %v5371_v33 = vld [vmem:[#allocation7 + $0x740] sm:$0xff]   ;;  %v5396_v56 = vld [vmem:[#allocation7 + $0x730] sm:$0xff]   ;;  %v5399_v42 = vld [vmem:[#allocation7 + $0x778] sm:$0xff]  }
 0x302   :  { %4839 = vmatpush3.bf16.msra.mxu0 %v5338_v12  ;;  %2970 = vmatprep.mubr.bf16.mxu0 %v2839_v59  ;;  %v5370_v12 = vld [vmem:[#allocation7 + $0x580] sm:$0xff]   ;;  %v3398_v44 = vsel %vm1207_vm0, %v3397_v19, %v3396_v20  ;;  %v3204_v19 = vrot.slane %v3020_v45, 3 }
 0x303   :  { %4904 = vmatprep.subr.bf16.mxu1 %v5339_v23  ;;  %4840 = vmatprep.subr.bf16.mxu0 %v5341_v35  ;;  %v3211_v23 = vpack.c.b16 %v3209_v25, %v3209_v25  ;;  %v3773_v35 = vsel %vm1207_vm0, %v3772_v5, %v3771_v1  ;;  %v5372_v59 = vld [vmem:[#allocation7 + $0x700] sm:$0xff]   ;;  %v3402_v28 = vpack.c.b16 %v3398_v44, %v3398_v44  ;;  %v5404_v1 = vld [vmem:[#allocation7 + $0x688] sm:$0xff]   ;;  %v5406_v44 = vld [vmem:[#allocation7 + $0x690] sm:$0xff]  }
 0x304   :  { %3163 = vmatmul.mubr.bf16.vlgmr.msra.gmra.mrb[24].mxu1 %v3030_v55  ;;  %v5375_v55 = vld [vmem:[#allocation7 + $0x748] sm:$0xff]   ;;  %v5401_v5 = vld [vmem:[#allocation7 + $0x6c0] sm:$0xff]  }
 0x305   :  { %4905 = vmatpush3.bf16.msra.mxu1 %v5340_v47  ;;  %3534 = vmatprep.mubr.bf16.mxu1 %v3403_v61  ;;  %v5374_v47 = vld [vmem:[#allocation7 + $0x588] sm:$0xff]   ;;  %v5378_v61 = vld [vmem:[#allocation7 + $0x590] sm:$0xff]  }
 0x306   :  { %4841 = vmatpush3.bf16.msra.mxu0 %v5342_v38  ;;  %4906 = vmatprep.subr.bf16.mxu1 %v5343_v62  ;;  %v3775_v38 = vpack.c.b16 %v3773_v35, %v3773_v35  ;;  %v5376_v62 = vld [vmem:[#allocation7 + $0x708] sm:$0xff]   ;;  %v5410_v35 = vld [vmem:[#allocation7 + $0x6a0] sm:$0xff]  }
 0x307   :  { %4842 = vmatprep.subr.bf16.mxu0 %v5345_v8  ;;  %v5379_v8 = vld [vmem:[#allocation7 + $0x750] sm:$0xff]  }
 0x309   :  { %4907 = vmatpush3.bf16.msra.mxu1 %v5344_v52  ;;  %v5381_v52 = vld [vmem:[#allocation7 + $0x5d8] sm:$0xff]  }
 0x30a   :  { %4843 = vmatpush3.bf16.msra.mxu0 %v5346_v57  ;;  %4908 = vmatprep.subr.bf16.mxu1 %v5347_v53  ;;  %v5380_v57 = vld [vmem:[#allocation7 + $0x710] sm:$0xff]   ;;  %v5382_v53 = vld [vmem:[#allocation7 + $0x598] sm:$0xff]  }
 0x30b   :  { %4844 = vmatprep.subr.bf16.mxu0 %v5349_v54  ;;  %v5383_v54 = vld [vmem:[#allocation7 + $0x758] sm:$0xff]  }
 0x30d   :  { %4909 = vmatpush3.bf16.msra.mxu1 %v5348_v26  ;;  %v5385_v26 = vld [vmem:[#allocation7 + $0x5e0] sm:$0xff]  }
 0x30e   :  { %4845 = vmatpush3.bf16.msra.mxu0 %v5350_v46  ;;  %4910 = vmatprep.subr.bf16.mxu1 %v5351_v24  ;;  %v5384_v46 = vld [vmem:[#allocation7 + $0x718] sm:$0xff]   ;;  %v5386_v24 = vld [vmem:[#allocation7 + $0x5a0] sm:$0xff]  }
 0x30f   :  { %4846 = vmatprep.subr.bf16.mxu0 %v5353_v50  ;;  %v5387_v50 = vld [vmem:[#allocation7 + $0x760] sm:$0xff]  }
 0x311   :  { %4911 = vmatpush3.bf16.msra.mxu1 %v5352_v31  ;;  %v5389_v31 = vld [vmem:[#allocation7 + $0x5e8] sm:$0xff]  }
 0x312   :  { %4847 = vmatpush3.bf16.msra.mxu0 %v5354_v0  ;;  %4912 = vmatprep.subr.bf16.mxu1 %v5355_v3  ;;  %v5388_v0 = vld [vmem:[#allocation7 + $0x720] sm:$0xff]   ;;  %v5390_v3 = vld [vmem:[#allocation7 + $0x5a8] sm:$0xff]  }
 0x313   :  { %4848 = vmatprep.subr.bf16.mxu0 %v5357_v9  ;;  %v5391_v9 = vld [vmem:[#allocation7 + $0x768] sm:$0xff]  }
 0x315   :  { %4913 = vmatpush3.bf16.msra.mxu1 %v5356_v11  ;;  %v5393_v11 = vld [vmem:[#allocation7 + $0x5f0] sm:$0xff]  }
 0x316   :  { %4849 = vmatpush3.bf16.msra.mxu0 %v5358_v15  ;;  %4914 = vmatprep.subr.bf16.mxu1 %v5359_v40  ;;  %v6134_v15 = vld [vmem:[#allocation3 + $0x10] sm:$0x80]  ;;  %v5392_v40 = vld [vmem:[#allocation7 + $0x728] sm:$0xff]  }
 0x317   :  { %4850 = vmatprep.subr.bf16.mxu0 %v5361_v43  ;;  %v5394_v43 = vld [vmem:[#allocation7 + $0x5b0] sm:$0xff]  }
 0x319   :  { %4915 = vmatpush3.bf16.msra.mxu1 %v5360_v17  ;;  %v5395_v17 = vld [vmem:[#allocation7 + $0x770] sm:$0xff]  }
 0x31a   :  { %4851 = vmatpush3.bf16.msra.mxu0 %v5362_v48  ;;  %4916 = vmatprep.subr.bf16.mxu1 %v5363_v21  ;;  %v6136_v48 = vld [vmem:[#allocation3] sm:$0x80]  ;;  %v5397_v21 = vld [vmem:[#allocation7 + $0x5f8] sm:$0xff]  }
 0x31b   :  { %4852 = vmatprep.subr.bf16.mxu0 %v5365_v32  ;;  %v3766_v32 = vunpack.c.h.b16 %v6134_v15 }
 0x31d   :  { %4917 = vmatpush3.bf16.msra.mxu1 %v5364_v30  ;;  %v3205_v30 = vrot.slane %v3022_v4, 2  ;;  %v3769_v4 = vrot.slane %v3766_v32, 5 }
 0x31e   :  { %4853 = vmatpush3.bf16.msra.mxu0 %v5366_v2  ;;  %4918 = vmatprep.subr.bf16.mxu1 %v5367_v6  ;;  %v3580_v2 = vrot.slane %v3395_v60, 4  ;;  %v3764_v6 = vunpack.c.h.b16 %v6136_v48  ;;  %v5400_v60 = vld [vmem:[#allocation7 + $0x738] sm:$0xff]  }
 0x31f   :  { %4882 = vmatprep.subr.bf16.mxu0 %v5369_v39  ;;  %v5398_v39 = vld [vmem:[#allocation7 + $0x5b8] sm:$0xff]   ;;  %v3206_v10 = vsel %vm1207_vm0, %v3205_v30, %v3204_v19  ;;  %v5427_v30 = vld [vmem:[#allocation7 + $0x7e8] sm:$0xff]  }
 0x320   :  { %v3768_v25 = vrot.slane %v3764_v6, 6  ;;  %v3210_v45 = vpack.c.b16 %v3206_v10, %v3206_v10 }
 0x321   :  { %4919 = vmatpush3.bf16.msra.mxu1 %v5368_v58  ;;  %2971 = vmatmul.mubr.bf16.vlgmr.msra.gmra.mrb[24].mxu0 %v2838_v13  ;;  %v3581_v58 = vsel %vm1207_vm0, %v3580_v2, %v3579_v27  ;;  %v5405_v13 = vld [vmem:[#allocation7 + $0x6d0] sm:$0xff]  }
 0x322   :  { %4883 = vmatpush3.bf16.msra.mxu0 %v5370_v12  ;;  %3342 = vmatprep.mubr.bf16.mxu0 %v3211_v23  ;;  %v3770_v41 = vsel %vm1207_vm0, %v3769_v4, %v3768_v25  ;;  %v3583_v20 = vpack.c.b16 %v3581_v58, %v3581_v58  ;;  %v5409_v23 = vld [vmem:[#allocation7 + $0x6e0] sm:$0xff]   ;;  %v5429_v2 = vld [vmem:[#allocation7 + $0x7f0] sm:$0xff]  }
 0x323   :  { %4948 = vmatprep.subr.bf16.mxu1 %v5371_v33  ;;  %4884 = vmatprep.subr.bf16.mxu0 %v5373_v51  ;;  %v3774_v12 = vpack.c.b16 %v3770_v41, %v3770_v41  ;;  %v5407_v33 = vld [vmem:[#allocation7 + $0x6d8] sm:$0xff]   ;;  %v5430_v27 = vld [vmem:[#allocation7 + $0x7b0] sm:$0xff]  }
 0x324   :  { %3535 = vmatmul.mubr.bf16.vlgmr.msra.gmra.mrb[28].mxu1 %v3402_v28  ;;  %v5408_v51 = vld [vmem:[#allocation7 + $0x698] sm:$0xff]   ;;  %v5412_v28 = vld [vmem:[#allocation7 + $0x6a8] sm:$0xff]  }
 0x325   :  { %4949 = vmatpush3.bf16.msra.mxu1 %v5372_v59  ;;  %3906 = vmatprep.mubr.bf16.mxu1 %v3775_v38  ;;  %v5411_v59 = vld [vmem:[#allocation7 + $0x6e8] sm:$0xff]  }
 0x326   :  { %4885 = vmatpush3.bf16.msra.mxu0 %v5374_v47  ;;  %4950 = vmatprep.subr.bf16.mxu1 %v5375_v55  ;;  %v5413_v47 = vld [vmem:[#allocation7 + $0x6f0] sm:$0xff]  }
 0x327   :  { %4886 = vmatprep.subr.bf16.mxu0 %v5377_v14 }
 0x329   :  { %4951 = vmatpush3.bf16.msra.mxu1 %v5376_v62 }
 0x32a   :  { %4887 = vmatpush3.bf16.msra.mxu0 %v5378_v61  ;;  %4952 = vmatprep.subr.bf16.mxu1 %v5379_v8  ;;  %v5414_v61 = vld [vmem:[#allocation7 + $0x6b0] sm:$0xff]  }
 0x32b   :  { %4888 = vmatprep.subr.bf16.mxu0 %v5381_v52 }
 0x32d   :  { %4953 = vmatpush3.bf16.msra.mxu1 %v5380_v57  ;;  %v5415_v57 = vld [vmem:[#allocation7 + $0x6f8] sm:$0xff]  }
 0x32e   :  { %4889 = vmatpush3.bf16.msra.mxu0 %v5382_v53  ;;  %4954 = vmatprep.subr.bf16.mxu1 %v5383_v54  ;;  %v3577_v54 = vrot.slane %v3394_v34, 4  ;;  %v5418_v34 = vld [vmem:[#allocation7 + $0x780] sm:$0xff]  }
 0x32f   :  { %4890 = vmatprep.subr.bf16.mxu0 %v5385_v26 }
 0x331   :  { %4955 = vmatpush3.bf16.msra.mxu1 %v5384_v46 }
 0x332   :  { %4891 = vmatpush3.bf16.msra.mxu0 %v5386_v24  ;;  %4956 = vmatprep.subr.bf16.mxu1 %v5387_v50  ;;  %v3952_v24 = vrot.slane %v3767_v63, 6 }
 0x333   :  { %4892 = vmatprep.subr.bf16.mxu0 %v5389_v31  ;;  %v5416_v31 = vld [vmem:[#allocation7 + $0x6b8] sm:$0xff]  }
 0x335   :  { %4957 = vmatpush3.bf16.msra.mxu1 %v5388_v0  ;;  %v3576_v0 = vrot.slane %v3392_v29, 5  ;;  %v5421_v29 = vld [vmem:[#allocation7 + $0x7d0] sm:$0xff]  }
 0x336   :  { %4893 = vmatpush3.bf16.msra.mxu0 %v5390_v3  ;;  %4958 = vmatprep.subr.bf16.mxu1 %v5391_v9  ;;  %v5417_v3 = vld [vmem:[#allocation7 + $0x7c0] sm:$0xff]   ;;  %v3951_v9 = vrot.slane %v3765_v49, 7  ;;  %v5424_v49 = vld [vmem:[#allocation7 + $0x798] sm:$0xff]  }
 0x337   :  { %4894 = vmatprep.subr.bf16.mxu0 %v5393_v11  ;;  %v3578_v11 = vsel %vm1207_vm0, %v3577_v54, %v3576_v0  ;;  %v5433_v54 = vld [vmem:[%s6219_s7] sm:$0xff]   ;;  %v5434_v0 = vld [vmem:[%s6219_s7 + $0x8] sm:$0xff]  }
 0x338   :  { %v3953_v16 = vsel %vm1207_vm0, %v3952_v24, %v3951_v9  ;;  %v5518_v24 = vmov 0.0   ;;  %v5436_v9 = vld [vmem:[%s6219_s7 + $0x18] sm:$0xff]  }
 0x339   :  { %4959 = vmatpush3.bf16.msra.mxu1 %v5392_v40  ;;  %v3582_v40 = vpack.c.b16 %v3578_v11, %v3578_v11  ;;  %v3955_v63 = vpack.c.b16 %v3953_v16, %v3953_v16  ;;  %v5437_v11 = vld [vmem:[%s6219_s7 + $0x20] sm:$0xff]  }
 0x33a   :  { %4895 = vmatpush3.bf16.msra.mxu0 %v5394_v43  ;;  %4960 = vmatprep.subr.bf16.mxu1 %v5395_v17  ;;  %v5422_v43 = vld [vmem:[#allocation7 + $0x790] sm:$0xff]   ;;  %v5425_v17 = vld [vmem:[#allocation7 + $0x7e0] sm:$0xff]  }
 0x33b   :  { %4896 = vmatprep.subr.bf16.mxu0 %v5397_v21  ;;  %v5426_v21 = vld [vmem:[#allocation7 + $0x7a0] sm:$0xff]  }
 0x33d   :  { %4961 = vmatpush3.bf16.msra.mxu1 %v5396_v56  ;;  %v5428_v56 = vld [vmem:[#allocation7 + $0x7a8] sm:$0xff]  }
 0x33e   :  { %4897 = vmatpush3.bf16.msra.mxu0 %v5398_v39  ;;  %4962 = vmatprep.subr.bf16.mxu1 %v5399_v42 }
 0x33f   :  { %4926 = vmatprep.subr.bf16.mxu0 %v5401_v5 }
 0x341   :  { %4963 = vmatpush3.bf16.msra.mxu1 %v5400_v60  ;;  %3343 = vmatmul.mubr.bf16.vlgmr.msra.gmra.mrb[28].mxu0 %v3210_v45  ;;  %v5431_v60 = vld [vmem:[#allocation7 + $0x7f8] sm:$0xff]  }
 0x342   :  { %4927 = vmatpush3.bf16.msra.mxu0 %v5402_v37  ;;  %3714 = vmatprep.mubr.bf16.mxu0 %v3583_v20  ;;  %v3949_v37 = vrot.slane %v3766_v32, 6  ;;  %v5432_v20 = vld [vmem:[#allocation7 + $0x7b8] sm:$0xff]  }
 0x343   :  { %4928 = vmatprep.subr.bf16.mxu0 %v5403_v7  ;;  %5037 = vmatprep.subr.bf16.mxu1 %v5518_v24 }
 0x344   :  { %3907 = vmatmul.mubr.bf16.vlgmr.msra.gmra.mrb[32].mxu1 %v3774_v12  ;;  %v3948_v12 = vrot.slane %v3764_v6, 7 }
 0x345   :  { %5038 = vmatpush3.bf16.msra.mxu1 %v5433_v54  ;;  %5053 = vmatprep.mubr.msk.bf16.mxu1 %vm5519_vm1, %v5518_v24 }
 0x346   :  { %4929 = vmatpush3.bf16.msra.mxu0 %v5404_v1  ;;  %5039 = vmatprep.subr.bf16.mxu1 %v5518_v24 }
 0x347   :  { %4930 = vmatprep.subr.bf16.mxu0 %v5405_v13  ;;  %v3950_v13 = vsel %vm1207_vm0, %v3949_v37, %v3948_v12 }
 0x349   :  { %5040 = vmatpush3.bf16.msra.mxu1 %v5434_v0 }
 0x34a   :  { %4931 = vmatpush3.bf16.msra.mxu0 %v5406_v44  ;;  %v3954_v44 = vpack.c.b16 %v3950_v13, %v3950_v13  ;;  %5041 = vmatprep.subr.bf16.mxu1 %v5518_v24 }
 0x34b   :  { %4932 = vmatprep.subr.bf16.mxu0 %v5407_v33 }
 0x34e   :  { %4933 = vmatpush3.bf16.msra.mxu0 %v5408_v51 }
 0x34f   :  { %4934 = vmatprep.subr.bf16.mxu0 %v5409_v23 }
 0x352   :  { %4935 = vmatpush3.bf16.msra.mxu0 %v5410_v35 }
 0x353   :  { %4936 = vmatprep.subr.bf16.mxu0 %v5411_v59 }
 0x354   :  { %v4656_v55 = vpop.f32.mrb[4].mxu0 }
 0x355   :  { %v4657_v38 = vpop.f32.mrb[5].mxu0 }
 0x356   :  { %v4658_v14 = vadd.f32 %v4657_v38, %v4656_v55  ;;  %4937 = vmatpush3.bf16.msra.mxu0 %v5412_v28  ;;  %v4659_v62 = vpop.f32.mrb[6].mxu0 }
 0x357   :  { %v4700_v8 = vpop.f32.mrb[8].mxu1  ;;  %v4660_v52 = vpop.f32.mrb[7].mxu0  ;;  %4938 = vmatprep.subr.bf16.mxu0 %v5413_v47 }
 0x358   :  { %v4701_v53 = vpop.f32.mrb[9].mxu1 }
 0x359   :  { %v4702_v26 = vadd.f32 %v4701_v53, %v4700_v8  ;;  %v4703_v46 = vpop.f32.mrb[10].mxu1 }
 0x35a   :  { %v4704_v50 = vpop.f32.mrb[11].mxu1  ;;  %4939 = vmatpush3.bf16.msra.mxu0 %v5414_v61 }
 0x35b   :  { %4940 = vmatprep.subr.bf16.mxu0 %v5415_v57 }
 0x35e   :  { %4941 = vmatpush3.bf16.msra.mxu0 %v5416_v31 }
 0x35f   :  { %4970 = vmatprep.subr.bf16.mxu0 %v5417_v3  ;;  %v5435_v3 = vld [vmem:[%s6219_s7 + $0x10] sm:$0xff]  }
 0x360   :  { %5042 = vmatpush3.bf16.msra.mxu1 %v5435_v3 }
 0x361   :  { %3715 = vmatmul.mubr.bf16.vlgmr.msra.gmra.mrb[32].mxu0 %v3582_v40  ;;  %5043 = vmatprep.subr.bf16.mxu1 %v5518_v24 }
 0x362   :  { %4971 = vmatpush3.bf16.msra.mxu0 %v5418_v34  ;;  %4086 = vmatprep.mubr.bf16.mxu0 %v3955_v63 }
 0x363   :  { %4972 = vmatprep.subr.bf16.mxu0 %v5419_v18 }
 0x364   :  { %5044 = vmatpush3.bf16.msra.mxu1 %v5436_v9 }
 0x365   :  { %5045 = vmatprep.subr.bf16.mxu1 %v5518_v24 }
 0x366   :  { %4973 = vmatpush3.bf16.msra.mxu0 %v5420_v22 }
 0x367   :  { %4974 = vmatprep.subr.bf16.mxu0 %v5421_v29 }
 0x368   :  { %5046 = vmatpush3.bf16.msra.mxu1 %v5437_v11 }
 0x369   :  { %5047 = vmatprep.subr.bf16.mxu1 %v5518_v24 }
 0x36a   :  { %4975 = vmatpush3.bf16.msra.mxu0 %v5422_v43 }
 0x36b   :  { %4976 = vmatprep.subr.bf16.mxu0 %v5423_v36 }
 0x36e   :  { %4977 = vmatpush3.bf16.msra.mxu0 %v5424_v49 }
 0x36f   :  { %4978 = vmatprep.subr.bf16.mxu0 %v5425_v17 }
 0x372   :  { %4979 = vmatpush3.bf16.msra.mxu0 %v5426_v21 }
 0x373   :  { %4980 = vmatprep.subr.bf16.mxu0 %v5427_v30  ;;  %v5438_v30 = vld [vmem:[%s6219_s7 + $0x28] sm:$0xff]  }
 0x374   :  { %v4678_v39 = vpop.f32.mrb[8].mxu0  ;;  %5048 = vmatpush3.bf16.msra.mxu1 %v5438_v30 }
 0x375   :  { %v4679_v42 = vpop.f32.mrb[9].mxu0  ;;  %5049 = vmatprep.subr.bf16.mxu1 %v5518_v24 }
 0x376   :  { %v4680_v19 = vadd.f32 %v4679_v42, %v4678_v39  ;;  %v4681_v5 = vpop.f32.mrb[10].mxu0  ;;  %4981 = vmatpush3.bf16.msra.mxu0 %v5428_v56  ;;  %v5439_v56 = vld [vmem:[%s6219_s7 + $0x30] sm:$0xff]  }
 0x377   :  { %v4744_v4 = vpop.f32.mrb[12].mxu1  ;;  %v4682_v10 = vpop.f32.mrb[11].mxu0  ;;  %4982 = vmatprep.subr.bf16.mxu0 %v5429_v2  ;;  %v5440_v2 = vld [vmem:[%s6219_s7 + $0x38] sm:$0xff]  }
 0x378   :  { %v1490_v58 = vadd.f32 %v4680_v19, %v4658_v14  ;;  %v4745_v25 = vpop.f32.mrb[13].mxu1  ;;  %5050 = vmatpush3.bf16.msra.mxu1 %v5439_v56 }
 0x379   :  { %v4746_v45 = vadd.f32 %v4745_v25, %v4744_v4  ;;  %v4747_v41 = vpop.f32.mrb[14].mxu1  ;;  %5051 = vmatprep.subr.bf16.mxu1 %v5518_v24 }
 0x37a   :  { %v4748_v7 = vpop.f32.mrb[15].mxu1  ;;  %4983 = vmatpush3.bf16.msra.mxu0 %v5430_v27  ;;  %v1686_v1 = vadd.f32 %v4702_v26, %v1490_v58 }
 0x37b   :  { %4984 = vmatprep.subr.bf16.mxu0 %v5431_v60 }
 0x37c   :  { %5052 = vmatpush3.bf16.msra.mxu1 %v5440_v2 }
 0x37e   :  { %4985 = vmatpush3.bf16.msra.mxu0 %v5432_v20 }
 0x381   :  { %4087 = vmatmul.mubr.bf16.vlgmr.msra.gmra.mrb[36].mxu0 %v3954_v44 }
 0x394   :  { %v4722_v33 = vpop.f32.mrb[12].mxu0 }
 0x395   :  { %v4723_v51 = vpop.f32.mrb[13].mxu0 }
 0x396   :  { %v4724_v23 = vadd.f32 %v4723_v51, %v4722_v33  ;;  %v4725_v15 = vpop.f32.mrb[14].mxu0 }
 0x397   :  { %v4788_v32 = vpop.f32.mrb[16].mxu1  ;;  %v4726_v35 = vpop.f32.mrb[15].mxu0 }
 0x398   :  { %v1866_v59 = vadd.f32 %v4724_v23, %v1686_v1  ;;  %v4789_v28 = vpop.f32.mrb[17].mxu1 }
 0x399   :  { %v4790_v47 = vadd.f32 %v4789_v28, %v4788_v32  ;;  %v4791_v55 = vpop.f32.mrb[18].mxu1 }
 0x39a   :  { %v4792_v38 = vpop.f32.mrb[19].mxu1  ;;  %v2058_v48 = vadd.f32 %v4746_v45, %v1866_v59 }
 0x3b4   :  { %v4766_v6 = vpop.f32.mrb[16].mxu0 }
 0x3b5   :  { %v4767_v14 = vpop.f32.mrb[17].mxu0 }
 0x3b6   :  { %v4768_v62 = vadd.f32 %v4767_v14, %v4766_v6  ;;  %v4769_v61 = vpop.f32.mrb[18].mxu0 }
 0x3b7   :  { %v4832_v8 = vpop.f32.mrb[20].mxu1  ;;  %v4770_v52 = vpop.f32.mrb[19].mxu0 }
 0x3b8   :  { %v2238_v57 = vadd.f32 %v4768_v62, %v2058_v48  ;;  %v4833_v53 = vpop.f32.mrb[21].mxu1 }
 0x3b9   :  { %v4834_v26 = vadd.f32 %v4833_v53, %v4832_v8  ;;  %v4835_v46 = vpop.f32.mrb[22].mxu1  ;;  %v4608_v8 = vld [vmem:[%s6218_s6] ss:$0 sm:$0xff]  ;;  %s5485_s6 = scalar_lea.vmem %s4224_s22, 32 }
 0x3ba   :  { %v4836_v50 = vpop.f32.mrb[23].mxu1  ;;  %v2430_v31 = vadd.f32 %v4790_v47, %v2238_v57  ;;  %v4609_v46 = vld [vmem:[%s6220_s8] ss:$0 sm:$0xff]  ;;  %p5486_p2 = scmp.ne.s32.totalorder %s4224_s22, %s5485_s6  ;;  %p5491_p4 = scmp.lt.s32.totalorder %s5485_s6, %s5485_s6 }
 0x3bc   :  { %p5492_p5 = por %p5491_p4, %p5490_p3 }
 0x3be   :  { %p5493_p6 = pnand %p5492_p5, %p5486_p2 }
 0x3d4   :  { %v4810_v16 = vpop.f32.mrb[20].mxu0 }
 0x3d5   :  { %v4811_v34 = vpop.f32.mrb[21].mxu0 }
 0x3d6   :  { %v4812_v40 = vadd.f32 %v4811_v34, %v4810_v16  ;;  %v4813_v18 = vpop.f32.mrb[22].mxu0 }
 0x3d7   :  { %v4876_v63 = vpop.f32.mrb[24].mxu1  ;;  %v4814_v22 = vpop.f32.mrb[23].mxu0 }
 0x3d8   :  { %v2610_v29 = vadd.f32 %v4812_v40, %v2430_v31  ;;  %v4877_v43 = vpop.f32.mrb[25].mxu1 }
 0x3d9   :  { %v4878_v36 = vadd.f32 %v4877_v43, %v4876_v63  ;;  %v4879_v49 = vpop.f32.mrb[26].mxu1 }
 0x3da   :  { %v4880_v17 = vpop.f32.mrb[27].mxu1  ;;  %v2800_v21 = vadd.f32 %v4834_v26, %v2610_v29 }
 0x3f4   :  { %v4854_v39 = vpop.f32.mrb[24].mxu0 }
 0x3f5   :  { %v4855_v42 = vpop.f32.mrb[25].mxu0 }
 0x3f6   :  { %v4856_v19 = vadd.f32 %v4855_v42, %v4854_v39  ;;  %v4857_v5 = vpop.f32.mrb[26].mxu0 }
 0x3f7   :  { %v4920_v27 = vpop.f32.mrb[28].mxu1  ;;  %v4858_v4 = vpop.f32.mrb[27].mxu0 }
 0x3f8   :  { %v2978_v10 = vadd.f32 %v4856_v19, %v2800_v21  ;;  %v4921_v60 = vpop.f32.mrb[29].mxu1 }
 0x3f9   :  { %v4922_v58 = vadd.f32 %v4921_v60, %v4920_v27  ;;  %v4923_v25 = vpop.f32.mrb[30].mxu1 }
 0x3fa   :  { %v4924_v37 = vpop.f32.mrb[31].mxu1  ;;  %v3170_v45 = vadd.f32 %v4878_v36, %v2978_v10 }
 0x414   :  { %v4898_v41 = vpop.f32.mrb[28].mxu0 }
 0x415   :  { %v4899_v7 = vpop.f32.mrb[29].mxu0 }
 0x416   :  { %v4900_v20 = vadd.f32 %v4899_v7, %v4898_v41  ;;  %v4901_v12 = vpop.f32.mrb[30].mxu0 }
 0x417   :  { %v4964_v1 = vpop.f32.mrb[32].mxu1  ;;  %v4902_v13 = vpop.f32.mrb[31].mxu0 }
 0x418   :  { %v3350_v44 = vadd.f32 %v4900_v20, %v3170_v45  ;;  %v4965_v33 = vpop.f32.mrb[33].mxu1 }
 0x419   :  { %v4966_v51 = vadd.f32 %v4965_v33, %v4964_v1  ;;  %v4967_v23 = vpop.f32.mrb[34].mxu1 }
 0x41a   :  { %v4968_v15 = vpop.f32.mrb[35].mxu1  ;;  %v3542_v32 = vadd.f32 %v4922_v58, %v3350_v44 }
 0x434   :  { %v4942_v35 = vpop.f32.mrb[32].mxu0 }
 0x435   :  { %v4943_v59 = vpop.f32.mrb[33].mxu0 }
 0x436   :  { %v4944_v28 = vadd.f32 %v4943_v59, %v4942_v35  ;;  %v4945_v47 = vpop.f32.mrb[34].mxu0 }
 0x437   :  { %v4946_v55 = vpop.f32.mrb[35].mxu0 }
 0x438   :  { %v3722_v38 = vadd.f32 %v4944_v28, %v3542_v32 }
 0x43a   :  { %v3914_v48 = vadd.f32 %v4966_v51, %v3722_v38 }
 0x454   :  { %v4986_v6 = vpop.f32.mrb[36].mxu0 }
 0x455   :  { %v4987_v14 = vpop.f32.mrb[37].mxu0 }
 0x456   :  { %v4988_v62 = vadd.f32 %v4987_v14, %v4986_v6  ;;  %v4989_v61 = vpop.f32.mrb[38].mxu0 }
 0x457   :  { %v4990_v52 = vpop.f32.mrb[39].mxu0 }
 0x458   :  { %v4094_v57 = vadd.f32 %v4988_v62, %v3914_v48 }
 0x45a   :  { %v4102_v53 = vadd.f32 %v4608_v8, %v4094_v57 }
 0x45c   :  { %v4103_v54 = vmax.f32 %v4102_v53, 0.0 }
 0x45e   :  { %v4104_v26 = vpack.c.bf16 %v4103_v54, %v4103_v54 }
 0x460   :  { %5054 = vmatmul.mubr.bf16.vlgmr.msra.gmra.mrb[36].mxu1 %v4104_v26 }
 0x533   :  { %v4210_v24 = vpop.f32.mrb[36].mxu1 }
 0x534   :  { %v4211_v50 = vadd.f32 %v4609_v46, %v4210_v24  ;;  %v5055_v31 = vpop.f32.mrb[37].mxu1 }
 0x535   :  { %v4213_v0 = vpop.f32.mrb[38].mxu1 }
 0x536   :  { %4216 = vst [vmem:[#allocation9] sm:$0x3] %v4211_v50  ;;  %v5056_v3 = vpop.f32.mrb[39].mxu1 }
 0x537   :  { %5496 = shalt.err (!%p5493_p6)
}
 0x538   :  { %s5497_s8 = scalar_lea.hbm %s6221_s9, 32 }
 0x539   :  { %p5498_p7 = scmp.ne.s32.totalorder %s6221_s9, %s5497_s8  ;;  %p5501_p8 = scmp.lt.u32.totalorder %s5497_s8, %s6221_s9 }
 0x53b   :  { %p5503_p9 = pnand %p5501_p8, %p5498_p7 }
 0x53d   :  { %5506 = shalt.err (!%p5503_p9)
}
 0x53e   :  { %4226 = dma.vmem_to_hbm [thread:$0]  %s4224_s22, 32, %s6221_s9, [#allocation6]  }
 0x53f   :  { %5511 = dma.done.wait [#allocation6], 32  }
 0x540   :  { %5512 = vsyncadd [#allocation6], 4294967264 }
 0x541   :  { %4230 = vsyncpa [#allocation5], 1 }
 0x542   :  { %4231 = vsyncpa [#allocation8], 1 }
 0x543   :  { %4232 = vsyncpa [#allocation6], 1 }

</bundles_post_ra>
